<compile_context>
chip_gen: v7x
topology: tpu7x:2x2x1
jax: 0.10.0
libtpu: 0.0.40
codegen_flags: <defaults>
</compile_context>

<pallas_src>
import functools

import numpy as np

import jax
import jax.numpy as jnp
from jax import lax
from jax.experimental import pallas as pl
from jax.experimental.pallas import tpu as pltpu


# ----------------------------------------------------------------------------
# Fused Pallas kernel: the entire LeNet5_stat forward pass.
# ----------------------------------------------------------------------------

def lenet5_fused_kernel(x_ref, w1_ref, b1_ref, p1l_ref, p1r_ref,
                        w2_ref, b2_ref, p2l_ref, p2r_ref,
                        w3_ref, b3_ref, s3_ref,
                        fc1w_ref, fc1b_ref, fc2w_ref, fc2b_ref,
                        logits_ref, y_ref, *, batch):
    f32 = jnp.float32
    K = 5  # LeNet kernel size

    def nnz(v):  # number of nonzeros, as a (1, 1) int32
        return jnp.sum((v != 0.0).astype(jnp.int32), axis=(0, 1), keepdims=True)

    def conv_relu(act, w_ref, b_ref, rows, kdim):
        # act rows: b*H + h ; cols: w*Cin + ci.  Band matrix w_ref:
        # (K*kdim, ow*Cout) with kdim = w_in*Cin.  Accumulate over the K row shifts.
        acc = jnp.dot(act[0:rows, :], w_ref[0:kdim, :], preferred_element_type=f32)
        for dy in range(1, K):
            acc = acc + jnp.dot(act[dy:dy + rows, :],
                                w_ref[dy * kdim:(dy + 1) * kdim, :],
                                preferred_element_type=f32)
        return jnp.maximum(acc + b_ref[...], 0.0)

    # ---- stat 1: raw input (zero padding rows contribute nothing) -------------
    x = x_ref[...]                                                   # (B*32+8, 32)
    y1 = nnz(x)

    # ---- conv1 (1 -> 6, k=5) + ReLU + pool1 ------------------------------------
    h1 = conv_relu(x, w1_ref, b1_ref, batch * 32, 32)                # (B*32, 168)
    m1 = jnp.dot(p1l_ref[...],
                 jnp.dot(h1, p1r_ref[...], preferred_element_type=f32),
                 preferred_element_type=f32)                         # (B*14+8, 84)
    y2 = nnz(m1)

    # ---- conv2 (6 -> 16, k=5) + ReLU + pool2 -----------------------------------
    h2 = conv_relu(m1, w2_ref, b2_ref, batch * 14, 84)               # (B*14, 160)
    m2 = jnp.dot(p2l_ref[...],
                 jnp.dot(h2, p2r_ref[...], preferred_element_type=f32),
                 preferred_element_type=f32)                         # (B*5+8, 80)
    y3 = nnz(m2)

    # ---- conv3 (16 -> 120, k=5, 1x1 output) + ReLU ------------------------------
    h3 = conv_relu(m2, w3_ref, b3_ref, batch * 5, 80)                # (B*5, 120)
    # flatten: select the single valid spatial row per batch -> (B, 120)
    f3 = jnp.dot(s3_ref[...], h3, preferred_element_type=f32)
    y4 = nnz(f3)

    # ---- fc1 + ReLU, fc2 ---------------------------------------------------------
    z1 = jnp.maximum(jnp.dot(f3, fc1w_ref[...], preferred_element_type=f32)
                     + fc1b_ref[...], 0.0)                           # (B, 84)
    z2 = jnp.dot(z1, fc2w_ref[...], preferred_element_type=f32) + fc2b_ref[...]

    logits_ref[...] = z2.astype(logits_ref.dtype)
    # TODO(synk): PyTorch count_nonzero returns int64; int32 kept here (identical
    # values at these sizes, and x64 is disabled by default in JAX).
    y_ref[...] = y1 + y2 + y3 + y4


# ----------------------------------------------------------------------------
# Parameter construction / one-time host-side preparation
# ----------------------------------------------------------------------------

def init_params(key):
    ks = jax.random.split(key, 10)
    s = 0.1
    return {
        "conv1_w": s * jax.random.normal(ks[0], (6, 1, 5, 5), jnp.float32),
        "conv1_b": s * jax.random.normal(ks[1], (6,), jnp.float32),
        "conv2_w": s * jax.random.normal(ks[2], (16, 6, 5, 5), jnp.float32),
        "conv2_b": s * jax.random.normal(ks[3], (16,), jnp.float32),
        "conv3_w": s * jax.random.normal(ks[4], (120, 16, 5, 5), jnp.float32),
        "conv3_b": s * jax.random.normal(ks[5], (120,), jnp.float32),
        "fc1_w": s * jax.random.normal(ks[6], (84, 120), jnp.float32),
        "fc1_b": s * jax.random.normal(ks[7], (84,), jnp.float32),
        "fc2_w": s * jax.random.normal(ks[8], (10, 84), jnp.float32),
        "fc2_b": s * jax.random.normal(ks[9], (10,), jnp.float32),
    }


def prepare_params(p, batch):
    """One-time host-side rearrangement of PyTorch-layout parameters into the
    constant operands of the fused kernel (width-band conv weights, pooling
    matrices, transposed fc weights, tiled bias rows)."""
    B = batch

    def band(w, w_in):
        # w: (Cout, Cin, k, k) -> (k * w_in * Cin, ow * Cout) with
        # band[dy*w_in*Cin + p*Cin + ci, o*Cout + co] = w[co, ci, dy, p - o]
        w = np.asarray(w, np.float32)
        co, ci, k, _ = w.shape
        ow = w_in - k + 1
        out = np.zeros((k, w_in * ci, ow * co), np.float32)
        for dy in range(k):
            for dx in range(k):
                blk = w[:, :, dy, dx].T            # (Cin, Cout)
                for o in range(ow):
                    pcol = o + dx
                    out[dy, pcol * ci:(pcol + 1) * ci, o * co:(o + 1) * co] = blk
        return out.reshape(k * w_in * ci, ow * co)

    def bias_row(b, ow):
        return np.tile(np.asarray(b, np.float32), ow)[None, :]

    def pool_left(in_spacing, out_count, out_pad):
        # Row-pair averaging + per-batch row re-packing; extra zero rows at the
        # bottom keep the next conv's shifted row slices in bounds.
        m = np.zeros((B * out_count + out_pad, B * in_spacing), np.float32)
        for b in range(B):
            for q in range(out_count):
                m[b * out_count + q, b * in_spacing + 2 * q] = 0.5
                m[b * out_count + q, b * in_spacing + 2 * q + 1] = 0.5
        return m

    def pool_right(w_in, c):
        # Column-pair averaging in (width, channel) packed columns.
        m = np.zeros((w_in * c, (w_in // 2) * c), np.float32)
        for o in range(w_in // 2):
            for cc in range(c):
                m[(2 * o) * c + cc, o * c + cc] = 0.5
                m[(2 * o + 1) * c + cc, o * c + cc] = 0.5
        return m

    s3 = np.zeros((B, B * 5), np.float32)
    for b in range(B):
        s3[b, b * 5] = 1.0

    prep = {
        "w1": band(p["conv1_w"], 32), "b1": bias_row(p["conv1_b"], 28),
        "p1l": pool_left(32, 14, 8), "p1r": pool_right(28, 6),
        "w2": band(p["conv2_w"], 14), "b2": bias_row(p["conv2_b"], 10),
        "p2l": pool_left(14, 5, 8), "p2r": pool_right(10, 16),
        "w3": band(p["conv3_w"], 5), "b3": bias_row(p["conv3_b"], 1),
        "s3": s3,
        "fc1w": np.asarray(p["fc1_w"], np.float32).T,
        "fc1b": np.asarray(p["fc1_b"], np.float32)[None, :],
        "fc2w": np.asarray(p["fc2_w"], np.float32).T,
        "fc2b": np.asarray(p["fc2_b"], np.float32)[None, :],
    }
    return {k: jnp.asarray(v, jnp.float32) for k, v in prep.items()}


# ----------------------------------------------------------------------------
# Forward pass: one pallas_call for the whole network
# ----------------------------------------------------------------------------

def lenet5_stat_forward(x, prep):
    """x: (B, 1, 32, 32) float32 NCHW.  Returns (logits (B, 10), y () int32)."""
    B = x.shape[0]
    # Fold (B, 1, 32, 32) -> (B*32, 32) and add 8 zero rows so every dy-shifted
    # slice used by conv1 stays in bounds (the padding never reaches valid outputs
    # and contributes nothing to count_nonzero).
    xp = jnp.pad(x.reshape(B * 32, 32), ((0, 8), (0, 0)))

    ins = (xp, prep["w1"], prep["b1"], prep["p1l"], prep["p1r"],
           prep["w2"], prep["b2"], prep["p2l"], prep["p2r"],
           prep["w3"], prep["b3"], prep["s3"],
           prep["fc1w"], prep["fc1b"], prep["fc2w"], prep["fc2b"])

    logits, y = pl.pallas_call(
        functools.partial(lenet5_fused_kernel, batch=B),
        out_shape=(jax.ShapeDtypeStruct((B, 10), jnp.float32),
                   jax.ShapeDtypeStruct((1, 1), jnp.int32)),
        in_specs=[pl.BlockSpec(a.shape, lambda: (0, 0)) for a in ins],
        out_specs=(pl.BlockSpec((B, 10), lambda: (0, 0)),
                   pl.BlockSpec((1, 1), lambda: (0, 0))),
    )(*ins)
    return logits, y[0, 0]


# ----------------------------------------------------------------------------
# Pure-JAX reference (only used for a sanity check in __main__)
# ----------------------------------------------------------------------------

def reference_forward(x, p):
    dn = ("NCHW", "OIHW", "NCHW")
    prec = lax.Precision.HIGHEST

    def conv(v, w, b):
        out = lax.conv_general_dilated(v, w, (1, 1), "VALID",
                                       dimension_numbers=dn, precision=prec)
        return out + b[None, :, None, None]

    def pool(v):
        return 0.25 * (v[:, :, 0::2, 0::2] + v[:, :, 0::2, 1::2]
                       + v[:, :, 1::2, 0::2] + v[:, :, 1::2, 1::2])

    y1 = jnp.count_nonzero(x)
    a = jax.nn.relu(conv(x, p["conv1_w"], p["conv1_b"]))
    a = pool(a)
    y2 = jnp.count_nonzero(a)
    a = jax.nn.relu(conv(a, p["conv2_w"], p["conv2_b"]))
    a = pool(a)
    y3 = jnp.count_nonzero(a)
    a = jax.nn.relu(conv(a, p["conv3_w"], p["conv3_b"]))
    a = a.reshape(-1, 120)
    y4 = jnp.count_nonzero(a)
    a = jax.nn.relu(jnp.dot(a, p["fc1_w"].T, precision=prec) + p["fc1_b"])
    a = jnp.dot(a, p["fc2_w"].T, precision=prec) + p["fc2_b"]
    return a, (y1 + y2 + y3 + y4).astype(jnp.int32)


if __name__ == "__main__":
    key = jax.random.PRNGKey(0)
    k_x, k_p = jax.random.split(key)

    # LeNet-5 topology requires 32x32 spatial input (so conv3 yields exactly 120 feats).
    batch = 2
    x = jax.random.normal(k_x, (batch, 1, 32, 32), jnp.float32)
    params = init_params(k_p)

    prep = prepare_params(params, batch)           # one-time host-side weight prep
    fwd = jax.jit(lenet5_stat_forward)

    logits, y = fwd(x, prep)
    jax.block_until_ready((logits, y))

    # Sanity check against a pure-JAX reference.
    ref_logits, ref_y = jax.jit(reference_forward)(x, params)
    np.testing.assert_allclose(np.asarray(logits), np.asarray(ref_logits),
                               rtol=1e-3, atol=1e-3)
    assert abs(int(y) - int(ref_y)) <= 4  # counts can differ only on FP near-zero ties
    assert logits.shape == (batch, 10)
    assert y.shape == ()
    print("KERNEL_OK")
</pallas_src>

<mosaic_0001>
module attributes {stable_mosaic.version = 11 : i64} {
  func.func @lenet5_fused_kernel(%arg0: memref<72x32xf32, #tpu.memory_space<vmem>>, %arg1: memref<160x168xf32, #tpu.memory_space<vmem>>, %arg2: memref<1x168xf32, #tpu.memory_space<vmem>>, %arg3: memref<36x64xf32, #tpu.memory_space<vmem>>, %arg4: memref<168x84xf32, #tpu.memory_space<vmem>>, %arg5: memref<420x160xf32, #tpu.memory_space<vmem>>, %arg6: memref<1x160xf32, #tpu.memory_space<vmem>>, %arg7: memref<18x28xf32, #tpu.memory_space<vmem>>, %arg8: memref<160x80xf32, #tpu.memory_space<vmem>>, %arg9: memref<400x120xf32, #tpu.memory_space<vmem>>, %arg10: memref<1x120xf32, #tpu.memory_space<vmem>>, %arg11: memref<2x10xf32, #tpu.memory_space<vmem>>, %arg12: memref<120x84xf32, #tpu.memory_space<vmem>>, %arg13: memref<1x84xf32, #tpu.memory_space<vmem>>, %arg14: memref<84x10xf32, #tpu.memory_space<vmem>>, %arg15: memref<1x10xf32, #tpu.memory_space<vmem>>, %arg16: memref<2x10xf32, #tpu.memory_space<vmem>>, %arg17: memref<1x1xi32, #tpu.memory_space<vmem>>) attributes {dimension_semantics = [], scalar_prefetch = 0 : i64, scratch_operands = 0 : i64, tpu.core_type = #tpu.core_type<tc>} {
    %c0 = arith.constant 0 : index
    %c0_0 = arith.constant 0 : index
    %0 = vector.load %arg0[%c0, %c0_0] : memref<72x32xf32, #tpu.memory_space<vmem>>, vector<72x32xf32>
    %cst = arith.constant 0.000000e+00 : f32
    %1 = vector.broadcast %cst : f32 to vector<72x32xf32>
    %2 = arith.cmpf one, %0, %1 : vector<72x32xf32>
    %3 = arith.extui %2 : vector<72x32xi1> to vector<72x32xi32>
    %4 = vector.shape_cast %3 : vector<72x32xi32> to vector<1x72x32xi32>
    %cst_1 = arith.constant dense<0> : vector<1xi32>
    %5 = vector.multi_reduction <add>, %4, %cst_1 [1, 2] : vector<1x72x32xi32> to vector<1xi32>
    %6 = vector.shape_cast %5 : vector<1xi32> to vector<1x1x1xi32>
    %7 = vector.extract %6[0, 0, 0] : i32 from vector<1x1x1xi32>
    %8 = vector.broadcast %7 : i32 to vector<1x1xi32>
    %9 = vector.extract_strided_slice %0 {offsets = [0, 0], sizes = [64, 32], strides = [1, 1]} : vector<72x32xf32> to vector<64x32xf32>
    %c0_2 = arith.constant 0 : index
    %c0_3 = arith.constant 0 : index
    %10 = vector.load %arg1[%c0_2, %c0_3] : memref<160x168xf32, #tpu.memory_space<vmem>>, vector<32x168xf32>
    %cst_4 = arith.constant dense<0.000000e+00> : vector<64x168xf32>
    %11 = tpu.matmul %9, %10, %cst_4 {dimension_numbers = #tpu.dot_dimension_numbers<[1], [0], [0], [1], [0, 0, 1, 1], [], []>} : vector<64x32xf32>, vector<32x168xf32>, vector<64x168xf32> -> vector<64x168xf32>
    %12 = vector.extract_strided_slice %0 {offsets = [1, 0], sizes = [64, 32], strides = [1, 1]} : vector<72x32xf32> to vector<64x32xf32>
    %c32 = arith.constant 32 : index
    %c0_5 = arith.constant 0 : index
    %13 = vector.load %arg1[%c32, %c0_5] : memref<160x168xf32, #tpu.memory_space<vmem>>, vector<32x168xf32>
    %cst_6 = arith.constant dense<0.000000e+00> : vector<64x168xf32>
    %14 = tpu.matmul %12, %13, %cst_6 {dimension_numbers = #tpu.dot_dimension_numbers<[1], [0], [0], [1], [0, 0, 1, 1], [], []>} : vector<64x32xf32>, vector<32x168xf32>, vector<64x168xf32> -> vector<64x168xf32>
    %15 = arith.addf %11, %14 : vector<64x168xf32>
    %16 = vector.extract_strided_slice %0 {offsets = [2, 0], sizes = [64, 32], strides = [1, 1]} : vector<72x32xf32> to vector<64x32xf32>
    %c64 = arith.constant 64 : index
    %c0_7 = arith.constant 0 : index
    %17 = vector.load %arg1[%c64, %c0_7] : memref<160x168xf32, #tpu.memory_space<vmem>>, vector<32x168xf32>
    %cst_8 = arith.constant dense<0.000000e+00> : vector<64x168xf32>
    %18 = tpu.matmul %16, %17, %cst_8 {dimension_numbers = #tpu.dot_dimension_numbers<[1], [0], [0], [1], [0, 0, 1, 1], [], []>} : vector<64x32xf32>, vector<32x168xf32>, vector<64x168xf32> -> vector<64x168xf32>
    %19 = arith.addf %15, %18 : vector<64x168xf32>
    %20 = vector.extract_strided_slice %0 {offsets = [3, 0], sizes = [64, 32], strides = [1, 1]} : vector<72x32xf32> to vector<64x32xf32>
    %c96 = arith.constant 96 : index
    %c0_9 = arith.constant 0 : index
    %21 = vector.load %arg1[%c96, %c0_9] : memref<160x168xf32, #tpu.memory_space<vmem>>, vector<32x168xf32>
    %cst_10 = arith.constant dense<0.000000e+00> : vector<64x168xf32>
    %22 = tpu.matmul %20, %21, %cst_10 {dimension_numbers = #tpu.dot_dimension_numbers<[1], [0], [0], [1], [0, 0, 1, 1], [], []>} : vector<64x32xf32>, vector<32x168xf32>, vector<64x168xf32> -> vector<64x168xf32>
    %23 = arith.addf %19, %22 : vector<64x168xf32>
    %24 = vector.extract_strided_slice %0 {offsets = [4, 0], sizes = [64, 32], strides = [1, 1]} : vector<72x32xf32> to vector<64x32xf32>
    %c128 = arith.constant 128 : index
    %c0_11 = arith.constant 0 : index
    %25 = vector.load %arg1[%c128, %c0_11] : memref<160x168xf32, #tpu.memory_space<vmem>>, vector<32x168xf32>
    %cst_12 = arith.constant dense<0.000000e+00> : vector<64x168xf32>
    %26 = tpu.matmul %24, %25, %cst_12 {dimension_numbers = #tpu.dot_dimension_numbers<[1], [0], [0], [1], [0, 0, 1, 1], [], []>} : vector<64x32xf32>, vector<32x168xf32>, vector<64x168xf32> -> vector<64x168xf32>
    %27 = arith.addf %23, %26 : vector<64x168xf32>
    %c0_13 = arith.constant 0 : index
    %c0_14 = arith.constant 0 : index
    %28 = vector.load %arg2[%c0_13, %c0_14] : memref<1x168xf32, #tpu.memory_space<vmem>>, vector<1x168xf32>
    %29 = vector.broadcast %28 : vector<1x168xf32> to vector<64x168xf32>
    %30 = arith.addf %27, %29 : vector<64x168xf32>
    %cst_15 = arith.constant 0.000000e+00 : f32
    %31 = vector.broadcast %cst_15 : f32 to vector<64x168xf32>
    %32 = arith.maximumf %30, %31 : vector<64x168xf32>
    %c0_16 = arith.constant 0 : index
    %c0_17 = arith.constant 0 : index
    %33 = vector.load %arg3[%c0_16, %c0_17] : memref<36x64xf32, #tpu.memory_space<vmem>>, vector<36x64xf32>
    %c0_18 = arith.constant 0 : index
    %c0_19 = arith.constant 0 : index
    %34 = vector.load %arg4[%c0_18, %c0_19] : memref<168x84xf32, #tpu.memory_space<vmem>>, vector<168x84xf32>
    %cst_20 = arith.constant dense<0.000000e+00> : vector<64x84xf32>
    %35 = tpu.matmul %32, %34, %cst_20 {dimension_numbers = #tpu.dot_dimension_numbers<[1], [0], [0], [1], [0, 0, 1, 1], [], []>} : vector<64x168xf32>, vector<168x84xf32>, vector<64x84xf32> -> vector<64x84xf32>
    %cst_21 = arith.constant dense<0.000000e+00> : vector<36x84xf32>
    %36 = tpu.matmul %33, %35, %cst_21 {dimension_numbers = #tpu.dot_dimension_numbers<[1], [0], [0], [1], [0, 0, 1, 1], [], []>} : vector<36x64xf32>, vector<64x84xf32>, vector<36x84xf32> -> vector<36x84xf32>
    %cst_22 = arith.constant 0.000000e+00 : f32
    %37 = vector.broadcast %cst_22 : f32 to vector<36x84xf32>
    %38 = arith.cmpf one, %36, %37 : vector<36x84xf32>
    %39 = arith.extui %38 : vector<36x84xi1> to vector<36x84xi32>
    %40 = vector.shape_cast %39 : vector<36x84xi32> to vector<1x36x84xi32>
    %cst_23 = arith.constant dense<0> : vector<1xi32>
    %41 = vector.multi_reduction <add>, %40, %cst_23 [1, 2] : vector<1x36x84xi32> to vector<1xi32>
    %42 = vector.shape_cast %41 : vector<1xi32> to vector<1x1x1xi32>
    %43 = vector.extract %42[0, 0, 0] : i32 from vector<1x1x1xi32>
    %44 = vector.broadcast %43 : i32 to vector<1x1xi32>
    %45 = vector.extract_strided_slice %36 {offsets = [0, 0], sizes = [28, 84], strides = [1, 1]} : vector<36x84xf32> to vector<28x84xf32>
    %c0_24 = arith.constant 0 : index
    %c0_25 = arith.constant 0 : index
    %46 = vector.load %arg5[%c0_24, %c0_25] : memref<420x160xf32, #tpu.memory_space<vmem>>, vector<84x160xf32>
    %cst_26 = arith.constant dense<0.000000e+00> : vector<28x160xf32>
    %47 = tpu.matmul %45, %46, %cst_26 {dimension_numbers = #tpu.dot_dimension_numbers<[1], [0], [0], [1], [0, 0, 1, 1], [], []>} : vector<28x84xf32>, vector<84x160xf32>, vector<28x160xf32> -> vector<28x160xf32>
    %48 = vector.extract_strided_slice %36 {offsets = [1, 0], sizes = [28, 84], strides = [1, 1]} : vector<36x84xf32> to vector<28x84xf32>
    %c84 = arith.constant 84 : index
    %c0_27 = arith.constant 0 : index
    %49 = vector.load %arg5[%c84, %c0_27] : memref<420x160xf32, #tpu.memory_space<vmem>>, vector<84x160xf32>
    %cst_28 = arith.constant dense<0.000000e+00> : vector<28x160xf32>
    %50 = tpu.matmul %48, %49, %cst_28 {dimension_numbers = #tpu.dot_dimension_numbers<[1], [0], [0], [1], [0, 0, 1, 1], [], []>} : vector<28x84xf32>, vector<84x160xf32>, vector<28x160xf32> -> vector<28x160xf32>
    %51 = arith.addf %47, %50 : vector<28x160xf32>
    %52 = vector.extract_strided_slice %36 {offsets = [2, 0], sizes = [28, 84], strides = [1, 1]} : vector<36x84xf32> to vector<28x84xf32>
    %c168 = arith.constant 168 : index
    %c0_29 = arith.constant 0 : index
    %53 = vector.load %arg5[%c168, %c0_29] : memref<420x160xf32, #tpu.memory_space<vmem>>, vector<84x160xf32>
    %cst_30 = arith.constant dense<0.000000e+00> : vector<28x160xf32>
    %54 = tpu.matmul %52, %53, %cst_30 {dimension_numbers = #tpu.dot_dimension_numbers<[1], [0], [0], [1], [0, 0, 1, 1], [], []>} : vector<28x84xf32>, vector<84x160xf32>, vector<28x160xf32> -> vector<28x160xf32>
    %55 = arith.addf %51, %54 : vector<28x160xf32>
    %56 = vector.extract_strided_slice %36 {offsets = [3, 0], sizes = [28, 84], strides = [1, 1]} : vector<36x84xf32> to vector<28x84xf32>
    %c252 = arith.constant 252 : index
    %c0_31 = arith.constant 0 : index
    %57 = vector.load %arg5[%c252, %c0_31] : memref<420x160xf32, #tpu.memory_space<vmem>>, vector<84x160xf32>
    %cst_32 = arith.constant dense<0.000000e+00> : vector<28x160xf32>
    %58 = tpu.matmul %56, %57, %cst_32 {dimension_numbers = #tpu.dot_dimension_numbers<[1], [0], [0], [1], [0, 0, 1, 1], [], []>} : vector<28x84xf32>, vector<84x160xf32>, vector<28x160xf32> -> vector<28x160xf32>
    %59 = arith.addf %55, %58 : vector<28x160xf32>
    %60 = vector.extract_strided_slice %36 {offsets = [4, 0], sizes = [28, 84], strides = [1, 1]} : vector<36x84xf32> to vector<28x84xf32>
    %c336 = arith.constant 336 : index
    %c0_33 = arith.constant 0 : index
    %61 = vector.load %arg5[%c336, %c0_33] : memref<420x160xf32, #tpu.memory_space<vmem>>, vector<84x160xf32>
    %cst_34 = arith.constant dense<0.000000e+00> : vector<28x160xf32>
    %62 = tpu.matmul %60, %61, %cst_34 {dimension_numbers = #tpu.dot_dimension_numbers<[1], [0], [0], [1], [0, 0, 1, 1], [], []>} : vector<28x84xf32>, vector<84x160xf32>, vector<28x160xf32> -> vector<28x160xf32>
    %63 = arith.addf %59, %62 : vector<28x160xf32>
    %c0_35 = arith.constant 0 : index
    %c0_36 = arith.constant 0 : index
    %64 = vector.load %arg6[%c0_35, %c0_36] : memref<1x160xf32, #tpu.memory_space<vmem>>, vector<1x160xf32>
    %65 = vector.broadcast %64 : vector<1x160xf32> to vector<28x160xf32>
    %66 = arith.addf %63, %65 : vector<28x160xf32>
    %cst_37 = arith.constant 0.000000e+00 : f32
    %67 = vector.broadcast %cst_37 : f32 to vector<28x160xf32>
    %68 = arith.maximumf %66, %67 : vector<28x160xf32>
    %c0_38 = arith.constant 0 : index
    %c0_39 = arith.constant 0 : index
    %69 = vector.load %arg7[%c0_38, %c0_39] : memref<18x28xf32, #tpu.memory_space<vmem>>, vector<18x28xf32>
    %c0_40 = arith.constant 0 : index
    %c0_41 = arith.constant 0 : index
    %70 = vector.load %arg8[%c0_40, %c0_41] : memref<160x80xf32, #tpu.memory_space<vmem>>, vector<160x80xf32>
    %cst_42 = arith.constant dense<0.000000e+00> : vector<28x80xf32>
    %71 = tpu.matmul %68, %70, %cst_42 {dimension_numbers = #tpu.dot_dimension_numbers<[1], [0], [0], [1], [0, 0, 1, 1], [], []>} : vector<28x160xf32>, vector<160x80xf32>, vector<28x80xf32> -> vector<28x80xf32>
    %cst_43 = arith.constant dense<0.000000e+00> : vector<18x80xf32>
    %72 = tpu.matmul %69, %71, %cst_43 {dimension_numbers = #tpu.dot_dimension_numbers<[1], [0], [0], [1], [0, 0, 1, 1], [], []>} : vector<18x28xf32>, vector<28x80xf32>, vector<18x80xf32> -> vector<18x80xf32>
    %cst_44 = arith.constant 0.000000e+00 : f32
    %73 = vector.broadcast %cst_44 : f32 to vector<18x80xf32>
    %74 = arith.cmpf one, %72, %73 : vector<18x80xf32>
    %75 = arith.extui %74 : vector<18x80xi1> to vector<18x80xi32>
    %76 = vector.shape_cast %75 : vector<18x80xi32> to vector<1x18x80xi32>
    %cst_45 = arith.constant dense<0> : vector<1xi32>
    %77 = vector.multi_reduction <add>, %76, %cst_45 [1, 2] : vector<1x18x80xi32> to vector<1xi32>
    %78 = vector.shape_cast %77 : vector<1xi32> to vector<1x1x1xi32>
    %79 = vector.extract %78[0, 0, 0] : i32 from vector<1x1x1xi32>
    %80 = vector.broadcast %79 : i32 to vector<1x1xi32>
    %81 = vector.extract_strided_slice %72 {offsets = [0, 0], sizes = [10, 80], strides = [1, 1]} : vector<18x80xf32> to vector<10x80xf32>
    %c0_46 = arith.constant 0 : index
    %c0_47 = arith.constant 0 : index
    %82 = vector.load %arg9[%c0_46, %c0_47] : memref<400x120xf32, #tpu.memory_space<vmem>>, vector<80x120xf32>
    %cst_48 = arith.constant dense<0.000000e+00> : vector<10x120xf32>
    %83 = tpu.matmul %81, %82, %cst_48 {dimension_numbers = #tpu.dot_dimension_numbers<[1], [0], [0], [1], [0, 0, 1, 1], [], []>} : vector<10x80xf32>, vector<80x120xf32>, vector<10x120xf32> -> vector<10x120xf32>
    %84 = vector.extract_strided_slice %72 {offsets = [1, 0], sizes = [10, 80], strides = [1, 1]} : vector<18x80xf32> to vector<10x80xf32>
    %c80 = arith.constant 80 : index
    %c0_49 = arith.constant 0 : index
    %85 = vector.load %arg9[%c80, %c0_49] : memref<400x120xf32, #tpu.memory_space<vmem>>, vector<80x120xf32>
    %cst_50 = arith.constant dense<0.000000e+00> : vector<10x120xf32>
    %86 = tpu.matmul %84, %85, %cst_50 {dimension_numbers = #tpu.dot_dimension_numbers<[1], [0], [0], [1], [0, 0, 1, 1], [], []>} : vector<10x80xf32>, vector<80x120xf32>, vector<10x120xf32> -> vector<10x120xf32>
    %87 = arith.addf %83, %86 : vector<10x120xf32>
    %88 = vector.extract_strided_slice %72 {offsets = [2, 0], sizes = [10, 80], strides = [1, 1]} : vector<18x80xf32> to vector<10x80xf32>
    %c160 = arith.constant 160 : index
    %c0_51 = arith.constant 0 : index
    %89 = vector.load %arg9[%c160, %c0_51] : memref<400x120xf32, #tpu.memory_space<vmem>>, vector<80x120xf32>
    %cst_52 = arith.constant dense<0.000000e+00> : vector<10x120xf32>
    %90 = tpu.matmul %88, %89, %cst_52 {dimension_numbers = #tpu.dot_dimension_numbers<[1], [0], [0], [1], [0, 0, 1, 1], [], []>} : vector<10x80xf32>, vector<80x120xf32>, vector<10x120xf32> -> vector<10x120xf32>
    %91 = arith.addf %87, %90 : vector<10x120xf32>
    %92 = vector.extract_strided_slice %72 {offsets = [3, 0], sizes = [10, 80], strides = [1, 1]} : vector<18x80xf32> to vector<10x80xf32>
    %c240 = arith.constant 240 : index
    %c0_53 = arith.constant 0 : index
    %93 = vector.load %arg9[%c240, %c0_53] : memref<400x120xf32, #tpu.memory_space<vmem>>, vector<80x120xf32>
    %cst_54 = arith.constant dense<0.000000e+00> : vector<10x120xf32>
    %94 = tpu.matmul %92, %93, %cst_54 {dimension_numbers = #tpu.dot_dimension_numbers<[1], [0], [0], [1], [0, 0, 1, 1], [], []>} : vector<10x80xf32>, vector<80x120xf32>, vector<10x120xf32> -> vector<10x120xf32>
    %95 = arith.addf %91, %94 : vector<10x120xf32>
    %96 = vector.extract_strided_slice %72 {offsets = [4, 0], sizes = [10, 80], strides = [1, 1]} : vector<18x80xf32> to vector<10x80xf32>
    %c320 = arith.constant 320 : index
    %c0_55 = arith.constant 0 : index
    %97 = vector.load %arg9[%c320, %c0_55] : memref<400x120xf32, #tpu.memory_space<vmem>>, vector<80x120xf32>
    %cst_56 = arith.constant dense<0.000000e+00> : vector<10x120xf32>
    %98 = tpu.matmul %96, %97, %cst_56 {dimension_numbers = #tpu.dot_dimension_numbers<[1], [0], [0], [1], [0, 0, 1, 1], [], []>} : vector<10x80xf32>, vector<80x120xf32>, vector<10x120xf32> -> vector<10x120xf32>
    %99 = arith.addf %95, %98 : vector<10x120xf32>
    %c0_57 = arith.constant 0 : index
    %c0_58 = arith.constant 0 : index
    %100 = vector.load %arg10[%c0_57, %c0_58] : memref<1x120xf32, #tpu.memory_space<vmem>>, vector<1x120xf32>
    %101 = vector.broadcast %100 : vector<1x120xf32> to vector<10x120xf32>
    %102 = arith.addf %99, %101 : vector<10x120xf32>
    %cst_59 = arith.constant 0.000000e+00 : f32
    %103 = vector.broadcast %cst_59 : f32 to vector<10x120xf32>
    %104 = arith.maximumf %102, %103 : vector<10x120xf32>
    %c0_60 = arith.constant 0 : index
    %c0_61 = arith.constant 0 : index
    %105 = vector.load %arg11[%c0_60, %c0_61] : memref<2x10xf32, #tpu.memory_space<vmem>>, vector<2x10xf32>
    %cst_62 = arith.constant dense<0.000000e+00> : vector<2x120xf32>
    %106 = tpu.matmul %105, %104, %cst_62 {dimension_numbers = #tpu.dot_dimension_numbers<[1], [0], [0], [1], [0, 0, 1, 1], [], []>} : vector<2x10xf32>, vector<10x120xf32>, vector<2x120xf32> -> vector<2x120xf32>
    %cst_63 = arith.constant 0.000000e+00 : f32
    %107 = vector.broadcast %cst_63 : f32 to vector<2x120xf32>
    %108 = arith.cmpf one, %106, %107 : vector<2x120xf32>
    %109 = arith.extui %108 : vector<2x120xi1> to vector<2x120xi32>
    %110 = vector.shape_cast %109 : vector<2x120xi32> to vector<1x2x120xi32>
    %cst_64 = arith.constant dense<0> : vector<1xi32>
    %111 = vector.multi_reduction <add>, %110, %cst_64 [1, 2] : vector<1x2x120xi32> to vector<1xi32>
    %112 = vector.shape_cast %111 : vector<1xi32> to vector<1x1x1xi32>
    %113 = vector.extract %112[0, 0, 0] : i32 from vector<1x1x1xi32>
    %114 = vector.broadcast %113 : i32 to vector<1x1xi32>
    %c0_65 = arith.constant 0 : index
    %c0_66 = arith.constant 0 : index
    %115 = vector.load %arg12[%c0_65, %c0_66] : memref<120x84xf32, #tpu.memory_space<vmem>>, vector<120x84xf32>
    %cst_67 = arith.constant dense<0.000000e+00> : vector<2x84xf32>
    %116 = tpu.matmul %106, %115, %cst_67 {dimension_numbers = #tpu.dot_dimension_numbers<[1], [0], [0], [1], [0, 0, 1, 1], [], []>} : vector<2x120xf32>, vector<120x84xf32>, vector<2x84xf32> -> vector<2x84xf32>
    %c0_68 = arith.constant 0 : index
    %c0_69 = arith.constant 0 : index
    %117 = vector.load %arg13[%c0_68, %c0_69] : memref<1x84xf32, #tpu.memory_space<vmem>>, vector<1x84xf32>
    %118 = vector.broadcast %117 : vector<1x84xf32> to vector<2x84xf32>
    %119 = arith.addf %116, %118 : vector<2x84xf32>
    %cst_70 = arith.constant 0.000000e+00 : f32
    %120 = vector.broadcast %cst_70 : f32 to vector<2x84xf32>
    %121 = arith.maximumf %119, %120 : vector<2x84xf32>
    %c0_71 = arith.constant 0 : index
    %c0_72 = arith.constant 0 : index
    %122 = vector.load %arg14[%c0_71, %c0_72] : memref<84x10xf32, #tpu.memory_space<vmem>>, vector<84x10xf32>
    %cst_73 = arith.constant dense<0.000000e+00> : vector<2x10xf32>
    %123 = tpu.matmul %121, %122, %cst_73 {dimension_numbers = #tpu.dot_dimension_numbers<[1], [0], [0], [1], [0, 0, 1, 1], [], []>} : vector<2x84xf32>, vector<84x10xf32>, vector<2x10xf32> -> vector<2x10xf32>
    %c0_74 = arith.constant 0 : index
    %c0_75 = arith.constant 0 : index
    %124 = vector.load %arg15[%c0_74, %c0_75] : memref<1x10xf32, #tpu.memory_space<vmem>>, vector<1x10xf32>
    %125 = vector.broadcast %124 : vector<1x10xf32> to vector<2x10xf32>
    %126 = arith.addf %123, %125 : vector<2x10xf32>
    %c0_76 = arith.constant 0 : index
    %c0_77 = arith.constant 0 : index
    %127 = vector.load %arg16[%c0_76, %c0_77] : memref<2x10xf32, #tpu.memory_space<vmem>>, vector<2x10xf32>
    tpu.vector_store %arg16[%c0_76, %c0_77], %126 {strides = array<i32>} : memref<2x10xf32, #tpu.memory_space<vmem>>, vector<2x10xf32>,
    %128 = arith.addi %8, %44 : vector<1x1xi32>
    %129 = arith.addi %128, %80 : vector<1x1xi32>
    %130 = arith.addi %129, %114 : vector<1x1xi32>
    %c0_78 = arith.constant 0 : index
    %c0_79 = arith.constant 0 : index
    %131 = vector.load %arg17[%c0_78, %c0_79] : memref<1x1xi32, #tpu.memory_space<vmem>>, vector<1x1xi32>
    tpu.vector_store %arg17[%c0_78, %c0_79], %130 {strides = array<i32>} : memref<1x1xi32, #tpu.memory_space<vmem>>, vector<1x1xi32>,
    return
  }
}

</mosaic_0001>

<bundles_post_ra>
// kernel: lenet5_stat_forward.1
= control target key start
LH: loop header
LB: loop body
LE: loop exit
PB: predicated region body
PF: predicated region fallthrough
CT: control target
= control target key end

     0   :  { %s5700_s0 = inlined_call_operand.vmem [shape: f32[72,32], index: 0, kind: input, shape index: {}]   ;;  %s5701_s1 = inlined_call_operand.vmem [shape: f32[160,168], index: 1, kind: input, shape index: {}]   ;;  %s5702_s2 = inlined_call_operand.vmem [shape: f32[1,168], index: 2, kind: input, shape index: {}]   ;;  %s5703_s3 = inlined_call_operand.vmem [shape: f32[36,64], index: 3, kind: input, shape index: {}]   ;;  %s5704_s4 = inlined_call_operand.vmem [shape: f32[168,84], index: 4, kind: input, shape index: {}]   ;;  %s5705_s5 = inlined_call_operand.vmem [shape: f32[420,160], index: 5, kind: input, shape index: {}]   ;;  %s5706_s6 = inlined_call_operand.vmem [shape: f32[1,160], index: 6, kind: input, shape index: {}]   ;;  %s5707_s7 = inlined_call_operand.vmem [shape: f32[18,28], index: 7, kind: input, shape index: {}]   ;;  %s5708_s8 = inlined_call_operand.vmem [shape: f32[160,80], index: 8, kind: input, shape index: {}]   ;;  %s5709_s9 = inlined_call_operand.vmem [shape: f32[400,120], index: 9, kind: input, shape index: {}]   ;;  %s5710_s10 = inlined_call_operand.vmem [shape: f32[1,120], index: 10, kind: input, shape index: {}]   ;;  %s5711_s11 = inlined_call_operand.vmem [shape: f32[2,10], index: 11, kind: input, shape index: {}]   ;;  %s5712_s12 = inlined_call_operand.vmem [shape: f32[120,84], index: 12, kind: input, shape index: {}]   ;;  %s5713_s13 = inlined_call_operand.vmem [shape: f32[1,84], index: 13, kind: input, shape index: {}]   ;;  %s5714_s14 = inlined_call_operand.vmem [shape: f32[84,10], index: 14, kind: input, shape index: {}]   ;;  %s5715_s15 = inlined_call_operand.vmem [shape: f32[1,10], index: 15, kind: input, shape index: {}]   ;;  %s5716_s16 = inlined_call_operand.hbm [shape: f32[2,10], index: 16, kind: output, shape index: {0}]   ;;  %s5717_s17 = inlined_call_operand.hbm [shape: s32[1,1], index: 17, kind: output, shape index: {1}]  }
   0x1   :  { %5720 = sst [smem:[#allocation8_spill]] %s5700_s0 }
   0x2   :  { %5721 = sst [smem:[#allocation9_spill]] %s5701_s1 }
   0x3   :  { %23 = vsyncpa [#allocation3], 0  ;;  %s5722_s26 = sld [smem:[#allocation9_spill]]  ;;  %v4181_v7 = vmov 0.0   ;;  %s5723_s29 = sld [smem:[#allocation8_spill]]  ;;  %vm147_vm0 = vcmask 1046528  }
   0x4   :  { %245 = vmatprep.mubr.f32.mxu0 %v4181_v7  ;;  %vm84_vm1 = vcmask 261120  }
   0x9   :  { %v131_v0 = vld [vmem:[%s5722_s26 + $0x48] sm:$0xff]  ;;  %v133_v1 = vld [vmem:[%s5722_s26 + $0x58] sm:$0xff]  ;;  %v130_v2 = vld [vmem:[%s5722_s26 + $0x40] sm:$0xff] }
   0xa   :  { %v3655_v3 = vpack.c.bf16 %v133_v1, %v131_v0  ;;  %v132_v4 = vld [vmem:[%s5722_s26 + $0x50] sm:$0xff]  ;;  %v135_v5 = vld [vmem:[%s5722_s26 + $0x68] sm:$0xff]  ;;  %v137_v6 = vld [vmem:[%s5722_s26 + $0x78] sm:$0xff] }
   0xb   :  { %v3657_v8 = vpack.c.bf16 %v132_v4, %v130_v2  ;;  %v3659_v9 = vpack.c.bf16 %v137_v6, %v135_v5  ;;  %v134_v10 = vld [vmem:[%s5722_s26 + $0x60] sm:$0xff]  ;;  %v136_v11 = vld [vmem:[%s5722_s26 + $0x70] sm:$0xff]  ;;  %v4311_v13 = vld [vmem:[%s5723_s29 + $0x8] sm:$0xff] }
   0xc   :  { %v4306_v12 = vld [vmem:[%s5723_s29] sm:$0xff]  ;;  %3656 = vmatprep.subr.bf16.mxu0 %v3655_v3  ;;  %v123_v14 = vld [vmem:[%s5722_s26 + $0x8] sm:$0xff]  ;;  %v3661_v15 = vpack.c.bf16 %v136_v11, %v134_v10  ;;  %v149_v17 = vrot.slane %v4311_v13, 1  ;;  %v125_v18 = vld [vmem:[%s5722_s26 + $0x18] sm:$0xff] }
   0xd   :  { %3658 = vmatpush1.bf16.msra.mxu0 %v3657_v8  ;;  %v148_v16 = vrot.slane %v4306_v12, 1  ;;  %v4324_v19 = vld [vmem:[%s5723_s29 + $0x10] sm:$0xff]  ;;  %v3663_v20 = vpack.c.bf16 %v125_v18, %v123_v14  ;;  %v122_v21 = vld [vmem:[%s5722_s26] sm:$0xff]  ;;  %v127_v23 = vld [vmem:[%s5722_s26 + $0x28] sm:$0xff] }
   0xe   :  { %3660 = vmatprep.subr.bf16.mxu0 %v3659_v9  ;;  %v124_v22 = vld [vmem:[%s5722_s26 + $0x10] sm:$0xff]  ;;  %v129_v24 = vld [vmem:[%s5722_s26 + $0x38] sm:$0xff]  ;;  %v151_v26 = vrot.slane %v4324_v19, 1  ;;  %v126_v30 = vld [vmem:[%s5722_s26 + $0x20] sm:$0xff] }
   0xf   :  { %v150_v25 = vsel %vm147_vm0, %v148_v16, %v149_v17  ;;  %v3665_v27 = vpack.c.bf16 %v124_v22, %v122_v21  ;;  %v4343_v28 = vld [vmem:[%s5723_s29 + $0x18] sm:$0xff]  ;;  %v3667_v29 = vpack.c.bf16 %v129_v24, %v127_v23  ;;  %v128_v31 = vld [vmem:[%s5722_s26 + $0x30] sm:$0xff]  ;;  %v424_v32 = vld [vmem:[%s5722_s26 + $0x88] sm:$0xff] }
  0x10   :  { %v426_v33 = vld [vmem:[%s5722_s26 + $0x98] sm:$0xff]  ;;  %v152_v34 = vsel %vm147_vm0, %v149_v17, %v151_v26  ;;  %v153_v35 = vrot.slane %v4343_v28, 1  ;;  %v3669_v36 = vpack.c.bf16 %v128_v31, %v126_v30  ;;  %v4364_v37 = vld [vmem:[%s5723_s29 + $0x20] sm:$0xff] }
  0x11   :  { %3662 = vmatpush1.bf16.msra.mxu0 %v3661_v15  ;;  %v3671_v38 = vpack.c.bf16 %v426_v33, %v424_v32  ;;  %v155_v40 = vrot.slane %v4364_v37, 1 }
  0x12   :  { %3664 = vmatprep.subr.bf16.mxu0 %v3663_v20  ;;  %v154_v39 = vsel %vm147_vm0, %v151_v26, %v153_v35 }
  0x14   :  { %3207 = vmatmul.mubr.msk.f32.vlgmr.msra.gmra.mrb[0].mxu0 %vm84_vm1, %v150_v25 }
  0x15   :  { %251 = vmatprep.mubr.f32.mxu0 %v4181_v7  ;;  %3666 = vmatpush1.bf16.msra.mxu0 %v3665_v27 }
  0x16   :  { %3668 = vmatprep.subr.bf16.mxu0 %v3667_v29 }
  0x18   :  { %3208 = vmatmul.mubr.msk.f32.gmra.mrb[2].mxu0 %vm84_vm1, %v152_v34 }
  0x19   :  { %257 = vmatprep.mubr.f32.mxu0 %v4181_v7  ;;  %3670 = vmatpush1.bf16.msra.mxu0 %v3669_v36 }
  0x1a   :  { %24 = vsyncpa [#allocation5], 0  ;;  %v4373_v41 = vld [vmem:[%s5723_s29 + $0x28] sm:$0xff]  ;;  %3672 = vmatprep.subr.bf16.mxu0 %v3671_v38  ;;  %v156_v42 = vsel %vm147_vm0, %v153_v35, %v155_v40  ;;  %v4382_v44 = vld [vmem:[%s5723_s29 + $0x30] sm:$0xff]  ;;  %v4182_v62 = vmov 0.0|0.0   ;;  %v432_v34 = vrot.slane %v4306_v12, 2 }
  0x1b   :  { %v157_v43 = vrot.slane %v4373_v41, 1  ;;  %v159_v46 = vrot.slane %v4382_v44, 1  ;;  %v4391_v47 = vld [vmem:[%s5723_s29 + $0x38] sm:$0xff]  ;;  %v4400_v50 = vld [vmem:[%s5723_s29 + $0x40] sm:$0xff]  ;;  %v425_v55 = vld [vmem:[%s5722_s26 + $0x90] sm:$0xff]  ;;  %3695 = vmatprep.subr.bf16.mxu1 %v4182_v62  ;;  %v433_v35 = vrot.slane %v4311_v13, 2 }
  0x1c   :  { %3209 = vmatmul.mubr.msk.f32.gmra.mrb[4].mxu0 %vm84_vm1, %v154_v39  ;;  %v161_v49 = vrot.slane %v4391_v47, 1  ;;  %v163_v52 = vrot.slane %v4400_v50, 1  ;;  %v423_v54 = vld [vmem:[%s5722_s26 + $0x80] sm:$0xff]  ;;  %v428_v56 = vld [vmem:[%s5722_s26 + $0xa8] sm:$0xff]  ;;  %v430_v57 = vld [vmem:[%s5722_s26 + $0xb8] sm:$0xff]  ;;  %vm431_vm2 = vcmask 1045504  }
  0x1d   :  { %263 = vmatprep.mubr.f32.mxu0 %v4181_v7  ;;  %v158_v45 = vsel %vm147_vm0, %v155_v40, %v157_v43  ;;  %v160_v48 = vsel %vm147_vm0, %v157_v43, %v159_v46  ;;  %v985_v58 = vld [vmem:[%s5704_s4] sm:$0xff]  ;;  %v986_v59 = vld [vmem:[%s5704_s4 + $0x8] sm:$0xff]  ;;  %v987_v60 = vld [vmem:[%s5704_s4 + $0x10] sm:$0xff]  ;;  %v3673_v61 = vpack.c.bf16 %v425_v55, %v423_v54  ;;  %v3675_v1 = vpack.c.bf16 %v430_v57, %v428_v56  ;;  %s4186_s0 = smov [#allocation4]  }
  0x1e   :  { %v162_v51 = vsel %vm147_vm0, %v159_v46, %v161_v49  ;;  %v164_v53 = vsel %vm147_vm0, %v161_v49, %v163_v52  ;;  %v3696_v63 = vpack.c.bf16 %v986_v59, %v985_v58  ;;  %v988_v0 = vld [vmem:[%s5704_s4 + $0x18] sm:$0xff]  ;;  %v427_v2 = vld [vmem:[%s5722_s26 + $0xa0] sm:$0xff]  ;;  %v429_v3 = vld [vmem:[%s5722_s26 + $0xb0] sm:$0xff]  ;;  %v434_v43 = vsel %vm431_vm2, %v432_v34, %v433_v35  ;;  %s3195_s30 = sshll.u32 %s4186_s0, 4  ;;  %s3196_s30 = int_to_ptr.vmem [resolvable:$true] %s3195_s30 }
  0x1f   :  { %v595_v4 = vld [vmem:[%s5722_s26 + $0xc8] sm:$0xff]  ;;  %v597_v5 = vld [vmem:[%s5722_s26 + $0xd8] sm:$0xff]  ;;  %v3699_v6 = vpack.c.bf16 %v988_v0, %v987_v60  ;;  %v989_v8 = vld [vmem:[%s5704_s4 + $0x20] sm:$0xff]  ;;  %v3677_v10 = vpack.c.bf16 %v429_v3, %v427_v2  ;;  %v437_v55 = vrot.slane %v4343_v28, 2  ;;  %v439_v59 = vrot.slane %v4364_v37, 2  ;;  %s4137_s18 = scalar_lea.vmem %s3196_s30, 32  ;;  %p4138_p1 = scmp.lt.s32.totalorder %s3196_s30, %s3196_s30 }
  0x20   :  { %3210 = vmatmul.mubr.msk.f32.gmra.mrb[6].mxu0 %vm84_vm1, %v156_v42  ;;  %3697 = vmatpush1.bf16.msra.mxu1 %v3696_v63  ;;  %v990_v9 = vld [vmem:[%s5704_s4 + $0x28] sm:$0xff]  ;;  %v3679_v11 = vpack.c.bf16 %v597_v5, %v595_v4  ;;  %v991_v15 = vld [vmem:[%s5704_s4 + $0x30] sm:$0xff]  ;;  %v992_v16 = vld [vmem:[%s5704_s4 + $0x38] sm:$0xff]  ;;  %v443_v0 = vrot.slane %v4382_v44, 2  ;;  %v445_v2 = vrot.slane %v4391_v47, 2  ;;  %v447_v4 = vrot.slane %v4400_v50, 2 }
  0x21   :  { %269 = vmatprep.mubr.f32.mxu0 %v4181_v7  ;;  %3698 = vmatprep.subr.bf16.mxu1 %v4182_v62  ;;  %v3702_v14 = vpack.c.bf16 %v990_v9, %v989_v8  ;;  %v3705_v17 = vpack.c.bf16 %v992_v16, %v991_v15  ;;  %v993_v18 = vld [vmem:[%s5704_s4 + $0x40] sm:$0xff]  ;;  %v994_v20 = vld [vmem:[%s5704_s4 + $0x48] sm:$0xff]  ;;  %v995_v22 = vld [vmem:[%s5704_s4 + $0x50] sm:$0xff]  ;;  %v440_v60 = vsel %vm431_vm2, %v437_v55, %v439_v59  ;;  %v604_v8 = vrot.slane %v4311_v13, 3 }
  0x22   :  { %v3708_v21 = vpack.c.bf16 %v994_v20, %v993_v18  ;;  %v996_v23 = vld [vmem:[%s5704_s4 + $0x58] sm:$0xff]  ;;  %v997_v25 = vld [vmem:[%s5704_s4 + $0x60] sm:$0xff]  ;;  %v998_v26 = vld [vmem:[%s5704_s4 + $0x68] sm:$0xff]  ;;  %v446_v3 = vsel %vm431_vm2, %v443_v0, %v445_v2  ;;  %v448_v5 = vsel %vm431_vm2, %v445_v2, %v447_v4  ;;  %vm602_vm3 = vcmask 1044480  }
  0x23   :  { %v3711_v24 = vpack.c.bf16 %v996_v23, %v995_v22  ;;  %v3714_v27 = vpack.c.bf16 %v998_v26, %v997_v25  ;;  %v999_v29 = vld [vmem:[%s5704_s4 + $0x70] sm:$0xff]  ;;  %v1000_v30 = vld [vmem:[%s5704_s4 + $0x78] sm:$0xff]  ;;  %v1001_v32 = vld [vmem:[%s5704_s4 + $0x80] sm:$0xff]  ;;  %v606_v16 = vrot.slane %v4324_v19, 3  ;;  %v608_v23 = vrot.slane %v4343_v28, 3 }
  0x24   :  { %3211 = vmatmul.mubr.msk.f32.gmra.mrb[8].mxu0 %vm84_vm1, %v158_v45  ;;  %3700 = vmatpush1.bf16.msra.mxu1 %v3699_v6  ;;  %v3717_v31 = vpack.c.bf16 %v1000_v30, %v999_v29  ;;  %v1002_v33 = vld [vmem:[%s5704_s4 + $0x88] sm:$0xff]  ;;  %v594_v36 = vld [vmem:[%s5722_s26 + $0xc0] sm:$0xff]  ;;  %v596_v38 = vld [vmem:[%s5722_s26 + $0xd0] sm:$0xff]  ;;  %v435_v45 = vrot.slane %v4324_v19, 2  ;;  %v603_v6 = vrot.slane %v4306_v12, 3  ;;  %v610_v26 = vrot.slane %v4364_v37, 3 }
  0x25   :  { %275 = vmatprep.mubr.f32.mxu0 %v4181_v7  ;;  %3701 = vmatprep.subr.bf16.mxu1 %v4182_v62  ;;  %v599_v39 = vld [vmem:[%s5722_s26 + $0xe8] sm:$0xff]  ;;  %v601_v40 = vld [vmem:[%s5722_s26 + $0xf8] sm:$0xff]  ;;  %v3720_v42 = vpack.c.bf16 %v1002_v33, %v1001_v32  ;;  %v3681_v46 = vpack.c.bf16 %v596_v38, %v594_v36  ;;  %v598_v49 = vld [vmem:[%s5722_s26 + $0xe0] sm:$0xff]  ;;  %v607_v22 = vsel %vm602_vm3, %v604_v8, %v606_v16  ;;  %v612_v29 = vrot.slane %v4373_v41, 3 }
  0x26   :  { %v766_v52 = vld [vmem:[%s5722_s26 + $0x108] sm:$0xff]  ;;  %v436_v54 = vsel %vm431_vm2, %v433_v35, %v435_v45  ;;  %v438_v58 = vsel %vm431_vm2, %v435_v45, %v437_v55  ;;  %v765_v9 = vld [vmem:[%s5722_s26 + $0x100] sm:$0xff]  ;;  %v605_v15 = vsel %vm602_vm3, %v603_v6, %v604_v8  ;;  %v609_v25 = vsel %vm602_vm3, %v606_v16, %v608_v23 }
  0x27   :  { %v769_v20 = vld [vmem:[%s5722_s26 + $0x120] sm:$0xff]  ;;  %v613_v30 = vsel %vm602_vm3, %v610_v26, %v612_v29  ;;  %v616_v33 = vrot.slane %v4391_v47, 3  ;;  %v618_v35 = vrot.slane %v4400_v50, 3  ;;  %v774_v38 = vrot.slane %v4306_v12, 4 }
  0x28   :  { %3212 = vmatmul.mubr.msk.f32.gmra.mrb[10].mxu0 %vm84_vm1, %v160_v48  ;;  %3703 = vmatpush1.bf16.msra.mxu1 %v3702_v14  ;;  %v3683_v48 = vpack.c.bf16 %v601_v40, %v599_v39  ;;  %v772_v14 = vld [vmem:[%s5722_s26 + $0x138] sm:$0xff]  ;;  %v775_v39 = vrot.slane %v4311_v13, 4  ;;  %vm773_vm4 = vcmask 1043456   ;;  %v779_v45 = vrot.slane %v4343_v28, 4 }
  0x29   :  { %281 = vmatprep.mubr.f32.mxu0 %v4181_v7  ;;  %3704 = vmatprep.subr.bf16.mxu1 %v4182_v62  ;;  %v619_v36 = vsel %vm602_vm3, %v616_v33, %v618_v35  ;;  %v787_v55 = vrot.slane %v4391_v47, 4  ;;  %vm1006_vm5 = vcmask 326656   ;;  %vm4183_vm6 = vmmov 0  }
  0x2a   :  { %v776_v40 = vsel %vm773_vm4, %v774_v38, %v775_v39  ;;  %vm1136_vm7 = vcmask 523264   ;;  %vm66_vm8 = vcmp.ne.f32.partialorder %v4306_v12, 0.0  ;;  %vm70_vm9 = vcmp.ne.f32.partialorder %v4364_v37, 0.0 }
  0x2b   :  { %vm67_vm10 = vcmp.ne.f32.partialorder %v4311_v13, 0.0  ;;  %vm68_vm11 = vcmp.ne.f32.partialorder %v4324_v19, 0.0  ;;  %vm69_vm12 = vcmp.ne.f32.partialorder %v4343_v28, 0.0  ;;  %vm71_vm13 = vcmp.ne.f32.partialorder %v4373_v41, 0.0 }
  0x2c   :  { %3213 = vmatmul.mubr.msk.f32.gmra.mrb[12].mxu0 %vm84_vm1, %v162_v51  ;;  %3706 = vmatpush1.bf16.msra.mxu1 %v3705_v17  ;;  %v600_v51 = vld [vmem:[%s5722_s26 + $0xf0] sm:$0xff]  ;;  %vm72_vm14 = vcmp.ne.f32.partialorder %v4382_v44, 0.0  ;;  %vm73_vm15 = vcmp.ne.f32.partialorder %v4391_v47, 0.0 }
  0x2d   :  { %287 = vmatprep.mubr.f32.mxu0 %v4181_v7  ;;  %3707 = vmatprep.subr.bf16.mxu1 %v4182_v62  ;;  %v3685_v56 = vpack.c.bf16 %v600_v51, %v598_v49  ;;  %v783_v51 = vrot.slane %v4373_v41, 4 }
  0x30   :  { %3214 = vmatmul.mubr.msk.f32.gmra.mrb[14].mxu0 %vm84_vm1, %v164_v53  ;;  %3709 = vmatpush1.bf16.msra.mxu1 %v3708_v21  ;;  %v768_v53 = vld [vmem:[%s5722_s26 + $0x118] sm:$0xff]  ;;  %v771_v21 = vld [vmem:[%s5722_s26 + $0x130] sm:$0xff] }
  0x31   :  { %374 = vmatprep.mubr.f32.mxu0 %v4181_v7  ;;  %3710 = vmatprep.subr.bf16.mxu1 %v4182_v62  ;;  %v3687_v57 = vpack.c.bf16 %v768_v53, %v766_v52  ;;  %v785_v53 = vrot.slane %v4382_v44, 4 }
  0x34   :  { %3215 = vmatmul.mubr.msk.f32.vlgmr.msra.gmra.mrb[0].mxu0 %vm84_vm1, %v4306_v12  ;;  %3712 = vmatpush1.bf16.msra.mxu1 %v3711_v24  ;;  %v3693_v24 = vpack.c.bf16 %v771_v21, %v769_v20 }
  0x35   :  { %380 = vmatprep.mubr.f32.mxu0 %v4181_v7  ;;  %3674 = vmatpush1.bf16.msra.mxu0 %v3673_v61  ;;  %v441_v61 = vrot.slane %v4373_v41, 2 }
  0x36   :  { %3676 = vmatprep.subr.bf16.mxu0 %v3675_v1  ;;  %3713 = vmatprep.subr.bf16.mxu1 %v4182_v62 }
  0x37   :  { %v442_v63 = vsel %vm431_vm2, %v439_v59, %v441_v61  ;;  %v444_v1 = vsel %vm431_vm2, %v441_v61, %v443_v0  ;;  %v1003_v59 = vld [vmem:[%s5704_s4 + $0x90] sm:$0xff]  ;;  %v938_v0 = vlaneseq }
  0x38   :  { %3216 = vmatmul.mubr.msk.f32.gmra.mrb[2].mxu0 %vm84_vm1, %v4311_v13  ;;  %3715 = vmatpush1.bf16.msra.mxu1 %v3714_v27  ;;  %v611_v27 = vsel %vm602_vm3, %v608_v23, %v610_v26 }
  0x39   :  { %386 = vmatprep.mubr.f32.mxu0 %v4181_v7  ;;  %3678 = vmatpush1.bf16.msra.mxu0 %v3677_v10  ;;  %v767_v10 = vld [vmem:[%s5722_s26 + $0x110] sm:$0xff] }
  0x3a   :  { %3680 = vmatprep.subr.bf16.mxu0 %v3679_v11  ;;  %3716 = vmatprep.subr.bf16.mxu1 %v4182_v62  ;;  %v770_v11 = vld [vmem:[%s5722_s26 + $0x128] sm:$0xff]  ;;  %v3689_v17 = vpack.c.bf16 %v767_v10, %v765_v9 }
  0x3b   :  { %v3691_v18 = vpack.c.bf16 %v772_v14, %v770_v11 }
  0x3c   :  { %3217 = vmatmul.mubr.msk.f32.gmra.mrb[4].mxu0 %vm84_vm1, %v4324_v19  ;;  %3718 = vmatpush1.bf16.msra.mxu1 %v3717_v31  ;;  %v614_v31 = vrot.slane %v4382_v44, 3 }
  0x3d   :  { %392 = vmatprep.mubr.f32.mxu0 %v4181_v7  ;;  %3719 = vmatprep.subr.bf16.mxu1 %v4182_v62 }
  0x3e   :  { %v615_v32 = vsel %vm602_vm3, %v612_v29, %v614_v31  ;;  %v617_v34 = vsel %vm602_vm3, %v614_v31, %v616_v33 }
  0x40   :  { %3218 = vmatmul.mubr.msk.f32.gmra.mrb[6].mxu0 %vm84_vm1, %v4343_v28  ;;  %3721 = vmatpush1.bf16.msra.mxu1 %v3720_v42  ;;  %v777_v42 = vrot.slane %v4324_v19, 4 }
  0x41   :  { %398 = vmatprep.mubr.f32.mxu0 %v4181_v7  ;;  %3722 = vmatprep.subr.bf16.mxu1 %v4182_v62 }
  0x44   :  { %3219 = vmatmul.mubr.msk.f32.gmra.mrb[8].mxu0 %vm84_vm1, %v4364_v37 }
  0x45   :  { %404 = vmatprep.mubr.f32.mxu0 %v4181_v7 }
  0x48   :  { %3220 = vmatmul.mubr.msk.f32.gmra.mrb[10].mxu0 %vm84_vm1, %v4373_v41 }
  0x49   :  { %410 = vmatprep.mubr.f32.mxu0 %v4181_v7 }
  0x4c   :  { %3221 = vmatmul.mubr.msk.f32.gmra.mrb[12].mxu0 %vm84_vm1, %v4382_v44 }
  0x4d   :  { %416 = vmatprep.mubr.f32.mxu0 %v4181_v7 }
  0x50   :  { %3222 = vmatmul.mubr.msk.f32.gmra.mrb[14].mxu0 %vm84_vm1, %v4391_v47 }
  0x51   :  { %529 = vmatprep.mubr.f32.mxu0 %v4181_v7 }
  0x54   :  { %3223 = vmatmul.mubr.msk.f32.vlgmr.msra.gmra.mrb[0].mxu0 %vm84_vm1, %v434_v43  ;;  %v778_v43 = vsel %vm773_vm4, %v775_v39, %v777_v42 }
  0x55   :  { %535 = vmatprep.mubr.f32.mxu0 %v4181_v7  ;;  %3682 = vmatpush1.bf16.msra.mxu0 %v3681_v46  ;;  %v780_v46 = vsel %vm773_vm4, %v777_v42, %v779_v45 }
  0x56   :  { %3684 = vmatprep.subr.bf16.mxu0 %v3683_v48  ;;  %v781_v48 = vrot.slane %v4364_v37, 4 }
  0x58   :  { %3224 = vmatmul.mubr.msk.f32.gmra.mrb[2].mxu0 %vm84_vm1, %v436_v54  ;;  %v782_v49 = vsel %vm773_vm4, %v779_v45, %v781_v48  ;;  %v784_v52 = vsel %vm773_vm4, %v781_v48, %v783_v51  ;;  %v786_v54 = vsel %vm773_vm4, %v783_v51, %v785_v53 }
  0x59   :  { %541 = vmatprep.mubr.f32.mxu0 %v4181_v7  ;;  %3686 = vmatpush1.bf16.msra.mxu0 %v3685_v56  ;;  %v788_v56 = vsel %vm773_vm4, %v785_v53, %v787_v55 }
  0x5a   :  { %3688 = vmatprep.subr.bf16.mxu0 %v3687_v57  ;;  %v789_v57 = vrot.slane %v4400_v50, 4 }
  0x5c   :  { %3225 = vmatmul.mubr.msk.f32.gmra.mrb[4].mxu0 %vm84_vm1, %v438_v58  ;;  %v790_v58 = vsel %vm773_vm4, %v787_v55, %v789_v57 }
  0x5d   :  { %547 = vmatprep.mubr.f32.mxu0 %v4181_v7 }
  0x60   :  { %3226 = vmatmul.mubr.msk.f32.gmra.mrb[6].mxu0 %vm84_vm1, %v440_v60  ;;  %v1004_v60 = vld [vmem:[%s5704_s4 + $0x98] sm:$0xff] }
  0x61   :  { %553 = vmatprep.mubr.f32.mxu0 %v4181_v7  ;;  %v3723_v61 = vpack.c.bf16 %v1004_v60, %v1003_v59 }
  0x63   :  { %3724 = vmatpush1.bf16.msra.mxu1 %v3723_v61 }
  0x64   :  { %3227 = vmatmul.mubr.msk.f32.gmra.mrb[8].mxu0 %vm84_vm1, %v442_v63  ;;  %1071 = vmatprep.subr.mxu1 %v4181_v7  ;;  %v1005_v63 = vld [vmem:[%s5704_s4 + $0xa0] sm:$0xff] }
  0x65   :  { %559 = vmatprep.mubr.f32.mxu0 %v4181_v7 }
  0x67   :  { %1072 = vmatpush1.msra.mxu1 %v1005_v63 }
  0x68   :  { %3228 = vmatmul.mubr.msk.f32.gmra.mrb[10].mxu0 %vm84_vm1, %v444_v1  ;;  %3725 = vmatprep.subr.bf16.mxu1 %v4182_v62  ;;  %v4675_v1 = vshrl.u32 %v938_v0, 7 }
  0x69   :  { %565 = vmatprep.mubr.f32.mxu0 %v4181_v7 }
  0x6a   :  { %v940_v2 = vsub.s32 0, %v4675_v1  ;;  %v944_v4 = vsub.s32 1, %v4675_v1 }
  0x6c   :  { %3229 = vmatmul.mubr.msk.f32.gmra.mrb[12].mxu0 %vm84_vm1, %v446_v3  ;;  %v936_v3 = vld [vmem:[%s5702_s2] sm:$0x3] }
  0x6d   :  { %571 = vmatprep.mubr.f32.mxu0 %v4181_v7  ;;  %v945_v6 = vrot.slane %v936_v3, %v944_v4 }
  0x70   :  { %3230 = vmatmul.mubr.msk.f32.gmra.mrb[14].mxu0 %vm84_vm1, %v448_v5  ;;  %v941_v5 = vrot.slane %v936_v3, %v940_v2 }
  0x71   :  { %700 = vmatprep.mubr.f32.mxu0 %v4181_v7 }
  0x74   :  { %3231 = vmatmul.mubr.msk.f32.vlgmr.msra.gmra.mrb[0].mxu0 %vm84_vm1, %v605_v15 }
  0x75   :  { %706 = vmatprep.mubr.f32.mxu0 %v4181_v7  ;;  %3690 = vmatpush1.bf16.msra.mxu0 %v3689_v17 }
  0x76   :  { %3692 = vmatprep.subr.bf16.mxu0 %v3691_v18 }
  0x78   :  { %3232 = vmatmul.mubr.msk.f32.gmra.mrb[2].mxu0 %vm84_vm1, %v607_v22 }
  0x79   :  { %712 = vmatprep.mubr.f32.mxu0 %v4181_v7  ;;  %3694 = vmatpush1.bf16.msra.mxu0 %v3693_v24 }
  0x7a   :  { %3837 = vmatprep.subr.bf16.mxu0 %v4182_v62 }
  0x7c   :  { %3233 = vmatmul.mubr.msk.f32.gmra.mrb[4].mxu0 %vm84_vm1, %v609_v25 }
  0x7d   :  { %718 = vmatprep.mubr.f32.mxu0 %v4181_v7 }
  0x80   :  { %3234 = vmatmul.mubr.msk.f32.gmra.mrb[6].mxu0 %vm84_vm1, %v611_v27 }
  0x81   :  { %724 = vmatprep.mubr.f32.mxu0 %v4181_v7 }
  0x84   :  { %3235 = vmatmul.mubr.msk.f32.gmra.mrb[8].mxu0 %vm84_vm1, %v613_v30 }
  0x85   :  { %730 = vmatprep.mubr.f32.mxu0 %v4181_v7 }
  0x88   :  { %3236 = vmatmul.mubr.msk.f32.gmra.mrb[10].mxu0 %vm84_vm1, %v615_v32 }
  0x89   :  { %736 = vmatprep.mubr.f32.mxu0 %v4181_v7 }
  0x8c   :  { %3237 = vmatmul.mubr.msk.f32.gmra.mrb[12].mxu0 %vm84_vm1, %v617_v34 }
  0x8d   :  { %742 = vmatprep.mubr.f32.mxu0 %v4181_v7 }
  0x90   :  { %3238 = vmatmul.mubr.msk.f32.gmra.mrb[14].mxu0 %vm84_vm1, %v619_v36 }
  0x91   :  { %871 = vmatprep.mubr.f32.mxu0 %v4181_v7 }
  0x94   :  { %3239 = vmatmul.mubr.msk.f32.vlgmr.msra.gmra.mrb[0].mxu0 %vm84_vm1, %v776_v40 }
  0x95   :  { %877 = vmatprep.mubr.f32.mxu0 %v4181_v7 }
  0x98   :  { %3240 = vmatmul.mubr.msk.f32.gmra.mrb[2].mxu0 %vm84_vm1, %v778_v43 }
  0x99   :  { %883 = vmatprep.mubr.f32.mxu0 %v4181_v7 }
  0x9c   :  { %3241 = vmatmul.mubr.msk.f32.gmra.mrb[4].mxu0 %vm84_vm1, %v780_v46 }
  0x9d   :  { %889 = vmatprep.mubr.f32.mxu0 %v4181_v7 }
  0xa0   :  { %3242 = vmatmul.mubr.msk.f32.gmra.mrb[6].mxu0 %vm84_vm1, %v782_v49 }
  0xa1   :  { %895 = vmatprep.mubr.f32.mxu0 %v4181_v7 }
  0xa4   :  { %3243 = vmatmul.mubr.msk.f32.gmra.mrb[8].mxu0 %vm84_vm1, %v784_v52 }
  0xa5   :  { %901 = vmatprep.mubr.f32.mxu0 %v4181_v7 }
  0xa8   :  { %3244 = vmatmul.mubr.msk.f32.gmra.mrb[10].mxu0 %vm84_vm1, %v786_v54 }
  0xa9   :  { %907 = vmatprep.mubr.f32.mxu0 %v4181_v7 }
  0xac   :  { %3245 = vmatmul.mubr.msk.f32.gmra.mrb[12].mxu0 %vm84_vm1, %v788_v56 }
  0xad   :  { %913 = vmatprep.mubr.f32.mxu0 %v4181_v7 }
  0xb0   :  { %3246 = vmatmul.mubr.msk.f32.gmra.mrb[14].mxu0 %vm84_vm1, %v790_v58 }
 0x167   :  { %v873_v8 = vpop.f32.mrb[0].mxu0 }
 0x168   :  { %v948_v9 = vadd.f32 %v941_v5, %v873_v8  ;;  %v875_v10 = vpop.f32.mrb[1].mxu0 }
 0x169   :  { %v949_v11 = vadd.f32 %v945_v6, %v875_v10 }
 0x16a   :  { %v964_v16 = vmax.f32 %v948_v9, 0.0 }
 0x16b   :  { %v965_v14 = vmax.f32 %v949_v11, 0.0  ;;  %v879_v15 = vpop.f32.mrb[2].mxu0 }
 0x16c   :  { %v950_v17 = vadd.f32 %v941_v5, %v879_v15  ;;  %v881_v18 = vpop.f32.mrb[3].mxu0 }
 0x16d   :  { %v951_v20 = vadd.f32 %v945_v6, %v881_v18  ;;  %3247 = vmatprep.mubr.msk.f32.mxu1 %vm1006_vm5, %v965_v14 }
 0x16e   :  { %1096 = vmatmul.mubr.f32.vlgmr.msra.gmra.mrb[0].mxu1 %v964_v16  ;;  %v966_v23 = vmax.f32 %v950_v17, 0.0 }
 0x16f   :  { %v967_v21 = vmax.f32 %v951_v20, 0.0  ;;  %v885_v22 = vpop.f32.mrb[4].mxu0  ;;  %v1306_v20 = vld [vmem:[%s5705_s5 + $0xa8] sm:$0xf0] }
 0x170   :  { %v952_v24 = vadd.f32 %v941_v5, %v885_v22  ;;  %v887_v25 = vpop.f32.mrb[5].mxu0  ;;  %v1310_v22 = vld [vmem:[%s5705_s5 + $0xc8] sm:$0xff] }
 0x171   :  { %v953_v26 = vadd.f32 %v945_v6, %v887_v25  ;;  %3248 = vmatprep.mubr.msk.f32.mxu1 %vm1006_vm5, %v967_v21  ;;  %v1308_v21 = vld [vmem:[%s5705_s5 + $0xb8] sm:$0xff] }
 0x172   :  { %1101 = vmatmul.mubr.f32.gmra.mrb[2].mxu1 %v966_v23  ;;  %v968_v30 = vmax.f32 %v952_v24, 0.0  ;;  %v1363_v24 = vrot.slane %v1306_v20, 4  ;;  %v1364_v25 = vrot.slane %v1308_v21, 4 }
 0x173   :  { %v969_v27 = vmax.f32 %v953_v26, 0.0  ;;  %v891_v29 = vpop.f32.mrb[6].mxu0  ;;  %v1368_v26 = vrot.slane %v1310_v22, 4 }
 0x174   :  { %v954_v31 = vadd.f32 %v941_v5, %v891_v29  ;;  %v893_v32 = vpop.f32.mrb[7].mxu0 }
 0x175   :  { %v955_v33 = vadd.f32 %v945_v6, %v893_v32  ;;  %3249 = vmatprep.mubr.msk.f32.mxu1 %vm1006_vm5, %v969_v27  ;;  %v1305_v27 = vld [vmem:[%s5705_s5 + $0xa0] sm:$0xf0] }
 0x176   :  { %1106 = vmatmul.mubr.f32.gmra.mrb[4].mxu1 %v968_v30  ;;  %v970_v36 = vmax.f32 %v954_v31, 0.0  ;;  %v1307_v30 = vld [vmem:[%s5705_s5 + $0xb0] sm:$0xff]  ;;  %v1309_v31 = vld [vmem:[%s5705_s5 + $0xc0] sm:$0xff] }
 0x177   :  { %v971_v34 = vmax.f32 %v955_v33, 0.0  ;;  %v897_v35 = vpop.f32.mrb[8].mxu0 }
 0x178   :  { %v956_v38 = vadd.f32 %v941_v5, %v897_v35  ;;  %v899_v39 = vpop.f32.mrb[9].mxu0  ;;  %v1314_v35 = vld [vmem:[%s5705_s5 + $0xe8] sm:$0xff] }
 0x179   :  { %v957_v40 = vadd.f32 %v945_v6, %v899_v39  ;;  %3250 = vmatprep.mubr.msk.f32.mxu1 %vm1006_vm5, %v971_v34  ;;  %v1312_v34 = vld [vmem:[%s5705_s5 + $0xd8] sm:$0xff]  ;;  %v1369_v39 = vsel %vm773_vm4, %v1364_v25, %v1368_v26 }
 0x17a   :  { %1111 = vmatmul.mubr.f32.gmra.mrb[6].mxu1 %v970_v36  ;;  %v972_v45 = vmax.f32 %v956_v38, 0.0  ;;  %v1360_v36 = vrot.slane %v1305_v27, 4  ;;  %v1365_v38 = vsel %vm773_vm4, %v1363_v24, %v1364_v25  ;;  %v1319_v25 = vld [vmem:[%s5705_s5 + $0x110] sm:$0xff]  ;;  %v981_v27 = vld [vmem:[%s5703_s3 + $0x8] sm:$0xff] }
 0x17b   :  { %v973_v42 = vmax.f32 %v957_v40, 0.0  ;;  %v903_v43 = vpop.f32.mrb[10].mxu0  ;;  %v1361_v40 = vrot.slane %v1307_v30, 4 }
 0x17c   :  { %v958_v46 = vadd.f32 %v941_v5, %v903_v43  ;;  %v905_v48 = vpop.f32.mrb[11].mxu0 }
 0x17d   :  { %v959_v49 = vadd.f32 %v945_v6, %v905_v48  ;;  %3251 = vmatprep.mubr.msk.f32.mxu1 %vm1006_vm5, %v973_v42  ;;  %v1366_v42 = vrot.slane %v1309_v31, 4  ;;  %v1311_v48 = vld [vmem:[%s5705_s5 + $0xd0] sm:$0xff] }
 0x17e   :  { %1116 = vmatmul.mubr.f32.gmra.mrb[8].mxu1 %v972_v45  ;;  %v974_v53 = vmax.f32 %v958_v46, 0.0  ;;  %v1372_v45 = vrot.slane %v1312_v34, 4  ;;  %v1376_v46 = vrot.slane %v1314_v35, 4 }
 0x17f   :  { %v975_v51 = vmax.f32 %v959_v49, 0.0  ;;  %v909_v52 = vpop.f32.mrb[12].mxu0  ;;  %v1313_v49 = vld [vmem:[%s5705_s5 + $0xe0] sm:$0xff] }
 0x180   :  { %v960_v54 = vadd.f32 %v941_v5, %v909_v52  ;;  %v911_v55 = vpop.f32.mrb[13].mxu0  ;;  %v1316_v52 = vld [vmem:[%s5705_s5 + $0xf8] sm:$0xff] }
 0x181   :  { %v961_v56 = vadd.f32 %v945_v6, %v911_v55  ;;  %3252 = vmatprep.mubr.msk.f32.mxu1 %vm1006_vm5, %v975_v51  ;;  %v1362_v55 = vsel %vm773_vm4, %v1360_v36, %v1361_v40 }
 0x182   :  { %1121 = vmatmul.mubr.f32.gmra.mrb[10].mxu1 %v974_v53  ;;  %v976_v59 = vmax.f32 %v960_v54, 0.0  ;;  %v1318_v53 = vld [vmem:[%s5705_s5 + $0x108] sm:$0xff]  ;;  %v3737_v54 = vpack.c.bf16 %v1369_v39, %v1365_v38  ;;  %v982_v38 = vld [vmem:[%s5703_s3 + $0x10] sm:$0xff] }
 0x183   :  { %v977_v57 = vmax.f32 %v961_v56, 0.0  ;;  %v915_v58 = vpop.f32.mrb[14].mxu0  ;;  %v1367_v56 = vsel %vm773_vm4, %v1361_v40, %v1366_v42 }
 0x184   :  { %v962_v60 = vadd.f32 %v941_v5, %v915_v58  ;;  %v917_v61 = vpop.f32.mrb[15].mxu0  ;;  %v1374_v58 = vrot.slane %v1313_v49, 4  ;;  %v1324_v49 = vld [vmem:[%s5705_s5 + $0x138] sm:$0xff] }
 0x185   :  { %v963_v63 = vadd.f32 %v945_v6, %v917_v61  ;;  %3253 = vmatprep.mubr.msk.f32.mxu1 %vm1006_vm5, %v977_v57  ;;  %v1370_v57 = vrot.slane %v1311_v48, 4  ;;  %v1377_v61 = vsel %vm773_vm4, %v1372_v45, %v1376_v46  ;;  %v984_v48 = vld [vmem:[%s5703_s3 + $0x20] sm:$0xf] }
 0x186   :  { %1126 = vmatmul.mubr.f32.gmra.mrb[12].mxu1 %v976_v59  ;;  %v978_v3 = vmax.f32 %v962_v60, 0.0  ;;  %v1373_v60 = vsel %vm773_vm4, %v1368_v26, %v1372_v45  ;;  %v1321_v26 = vld [vmem:[%s5705_s5 + $0x120] sm:$0xff]  ;;  %v983_v45 = vld [vmem:[%s5703_s3 + $0x18] sm:$0xff] }
 0x187   :  { %v979_v0 = vmax.f32 %v963_v63, 0.0  ;;  %v1380_v63 = vrot.slane %v1316_v52, 4  ;;  %v1390_v34 = vrot.slane %v1321_v26, 4  ;;  %v1396_v52 = vrot.slane %v1324_v49, 4  ;;  %v1287_v49 = vld [vmem:[%s5705_s5 + $0x20] sm:$0xff] }
 0x189   :  { %3254 = vmatprep.mubr.msk.f32.mxu1 %vm1006_vm5, %v979_v0  ;;  %v1384_v0 = vrot.slane %v1318_v53, 4  ;;  %vm74_vm5 = vcmp.ne.f32.partialorder %v4400_v50, 0.0 }
 0x18a   :  { %1131 = vmatmul.mubr.f32.gmra.mrb[14].mxu1 %v978_v3 }
 0x18b   :  { %3443 = vmatprep.mubr.msk.f32.mxu1 %vm4183_vm6, %v4181_v7  ;;  %v1385_v20 = vsel %vm773_vm4, %v1380_v63, %v1384_v0 }
 0x241   :  { %v1097_v8 = vpop.f32.mrb[0].mxu1 }
 0x242   :  { %v1099_v9 = vpop.f32.mrb[1].mxu1 }
 0x243   :  { %v1315_v9 = vld [vmem:[%s5705_s5 + $0xf0] sm:$0xff] }
 0x244   :  { %v1378_v21 = vrot.slane %v1315_v9, 4 }
 0x245   :  { %v1102_v10 = vpop.f32.mrb[2].mxu1 }
 0x246   :  { %v3726_v11 = vpack.c.bf16 %v1102_v10, %v1097_v8  ;;  %v1104_v14 = vpop.f32.mrb[3].mxu1  ;;  %v1317_v10 = vld [vmem:[%s5705_s5 + $0x100] sm:$0xff]  ;;  %v1379_v31 = vsel %vm773_vm4, %v1374_v58, %v1378_v21 }
 0x247   :  { %v1322_v14 = vld [vmem:[%s5705_s5 + $0x128] sm:$0xff]  ;;  %v1382_v22 = vrot.slane %v1317_v10, 4  ;;  %v4184_v10 = vmov 0  }
 0x248   :  { %3727 = vmatpush3.bf16.msra.mxu1 %v3726_v11  ;;  %v1320_v11 = vld [vmem:[%s5705_s5 + $0x118] sm:$0xff]  ;;  %v1392_v24 = vrot.slane %v1322_v14, 4  ;;  %v79_v14 = vsel %vm70_vm9, 1, %v4184_v10  ;;  %v76_v12 = vsel %vm67_vm10, 1, %v4184_v10  ;;  %v77_v13 = vsel %vm68_vm11, 1, %v4184_v10 }
 0x249   :  { %v1107_v5 = vpop.f32.mrb[4].mxu1  ;;  %3728 = vmatprep.subr.bf16.mxu1 %v4182_v62  ;;  %v78_v19 = vsel %vm69_vm12, 1, %v4184_v10  ;;  %v80_v28 = vsel %vm71_vm13, 1, %v4184_v10  ;;  %v81_v37 = vsel %vm72_vm14, 1, %v4184_v10  ;;  %v82_v41 = vsel %vm73_vm15, 1, %v4184_v10 }
 0x24a   :  { %v1109_v6 = vpop.f32.mrb[5].mxu1  ;;  %v83_v44 = vsel %vm74_vm5, 1, %v4184_v10  ;;  %v87_v50 = vsel %vm84_vm1, %v77_v13, 0  ;;  %v1293_v13 = vld [vmem:[%s5705_s5 + $0x50] sm:$0xff]  ;;  %vm1257_vm12 = vcmask 683008   ;;  %vm2276_vm15 = vcmask 228352  }
 0x24b   :  { %v3739_v6 = vpack.c.bf16 %v1367_v56, %v1362_v55  ;;  %v1325_v55 = vld [vmem:[%s5705_s5 + $0x140] sm:$0xff]  ;;  %vm2375_vm5 = vcmask 654336  }
 0x24d   :  { %v1112_v15 = vpop.f32.mrb[6].mxu1 }
 0x24e   :  { %v3729_v16 = vpack.c.bf16 %v1112_v15, %v1107_v5  ;;  %v1114_v17 = vpop.f32.mrb[7].mxu1  ;;  %v980_v5 = vld [vmem:[%s5703_s3] sm:$0xff]  ;;  %v3741_v15 = vpack.c.bf16 %v1377_v61, %v1373_v60 }
 0x24f   :  { %v1375_v17 = vsel %vm773_vm4, %v1370_v57, %v1374_v58  ;;  %v1397_v58 = vsel %vm773_vm4, %v1392_v24, %v1396_v52 }
 0x250   :  { %3730 = vmatpush3.bf16.msra.mxu1 %v3729_v16  ;;  %v1371_v16 = vsel %vm773_vm4, %v1366_v42, %v1370_v57  ;;  %v1398_v57 = vrot.slane %v1325_v55, 4 }
 0x251   :  { %v1117_v18 = vpop.f32.mrb[8].mxu1  ;;  %3731 = vmatprep.subr.bf16.mxu1 %v4182_v62 }
 0x252   :  { %v1119_v23 = vpop.f32.mrb[9].mxu1 }
 0x253   :  { %v1388_v23 = vrot.slane %v1320_v11, 4  ;;  %v75_v11 = vsel %vm66_vm8, 1, %v4184_v10 }
 0x254   :  { %v85_v47 = vsel %vm84_vm1, %v75_v11, 0 }
 0x255   :  { %v1122_v29 = vpop.f32.mrb[10].mxu1  ;;  %v1389_v35 = vsel %vm773_vm4, %v1384_v0, %v1388_v23  ;;  %v1393_v36 = vsel %vm773_vm4, %v1388_v23, %v1392_v24  ;;  %v97_v24 = vsel %vm84_vm1, %v83_v44, 0 }
 0x256   :  { %v3732_v32 = vpack.c.bf16 %v1122_v29, %v1117_v18  ;;  %v1124_v33 = vpop.f32.mrb[11].mxu1  ;;  %v1381_v18 = vsel %vm773_vm4, %v1376_v46, %v1380_v63  ;;  %v3743_v29 = vpack.c.bf16 %v1375_v17, %v1371_v16  ;;  %v3749_v40 = vpack.c.bf16 %v1393_v36, %v1389_v35  ;;  %v1283_v36 = vld [vmem:[%s5705_s5] sm:$0xff] }
 0x257   :  { %v3745_v30 = vpack.c.bf16 %v1385_v20, %v1381_v18  ;;  %v1386_v33 = vrot.slane %v1319_v25, 4  ;;  %v91_v17 = vsel %vm84_vm1, %v80_v28, 0  ;;  %v93_v18 = vsel %vm84_vm1, %v81_v37, 0 }
 0x258   :  { %3733 = vmatpush3.bf16.msra.mxu1 %v3732_v32  ;;  %v1383_v32 = vsel %vm773_vm4, %v1378_v21, %v1382_v22  ;;  %v95_v20 = vsel %vm84_vm1, %v82_v41, 0 }
 0x259   :  { %v1127_v43 = vpop.f32.mrb[12].mxu1  ;;  %3734 = vmatprep.subr.bf16.mxu1 %v4182_v62  ;;  %v3747_v39 = vpack.c.bf16 %v1383_v32, %v1379_v31  ;;  %v1387_v42 = vsel %vm773_vm4, %v1382_v22, %v1386_v33  ;;  %v94_v22 = vadd.s32 %v93_v18, %v87_v50  ;;  %v1298_v50 = vld [vmem:[%s5705_s5 + $0x78] sm:$0xff] }
 0x25a   :  { %v1129_v51 = vpop.f32.mrb[13].mxu1 }
 0x25b   :  { %v1326_v51 = vld [vmem:[%s5705_s5 + $0x148] sm:$0xff] }
 0x25c   :  { %v1400_v53 = vrot.slane %v1326_v51, 4 }
 0x25d   :  { %v1132_v59 = vpop.f32.mrb[14].mxu1 }
 0x25e   :  { %v3735_v3 = vpack.c.bf16 %v1132_v59, %v1127_v43  ;;  %v1134_v8 = vpop.f32.mrb[15].mxu1  ;;  %v1391_v43 = vsel %vm773_vm4, %v1386_v33, %v1390_v34  ;;  %v1401_v59 = vsel %vm773_vm4, %v1396_v52, %v1400_v53 }
 0x25f   :  { %v3751_v46 = vpack.c.bf16 %v1391_v43, %v1387_v42  ;;  %v3753_v60 = vpack.c.bf16 %v1401_v59, %v1397_v58  ;;  %v1286_v8 = vld [vmem:[%s5705_s5 + $0x18] sm:$0xff] }
 0x260   :  { %3736 = vmatpush3.bf16.msra.mxu1 %v3735_v3  ;;  %v1284_v3 = vld [vmem:[%s5705_s5 + $0x8] sm:$0xff] }
 0x261   :  { %3738 = vmatprep.subr.bf16.mxu1 %v3737_v54  ;;  %v1323_v54 = vld [vmem:[%s5705_s5 + $0x130] sm:$0xff]  ;;  %v3757_v9 = vpack.c.bf16 %v1286_v8, %v1284_v3 }
 0x262   :  { %v1394_v56 = vrot.slane %v1323_v54, 4 }
 0x263   :  { %3444 = vmatmul.mubr.msk.f32.vlgmr.msra.gmra.mrb[16].mxu1 %vm1136_vm7, %v980_v5  ;;  %v86_v5 = vsel %vm84_vm1, %v76_v12, 0 }
 0x264   :  { %3446 = vmatprep.mubr.msk.f32.mxu1 %vm4183_vm6, %v4181_v7  ;;  %3740 = vmatpush1.bf16.msra.mxu1 %v3739_v6  ;;  %v1395_v61 = vsel %vm773_vm4, %v1390_v34, %v1394_v56  ;;  %v1399_v63 = vsel %vm773_vm4, %v1394_v56, %v1398_v57  ;;  %v88_v6 = vsel %vm84_vm1, %v78_v19, 0  ;;  %v92_v21 = vadd.s32 %v91_v17, %v86_v5  ;;  %v1289_v56 = vld [vmem:[%s5705_s5 + $0x30] sm:$0xff]  ;;  %v1296_v5 = vld [vmem:[%s5705_s5 + $0x68] sm:$0xff] }
 0x265   :  { %3742 = vmatprep.subr.bf16.mxu1 %v3741_v15  ;;  %v3755_v0 = vpack.c.bf16 %v1399_v63, %v1395_v61  ;;  %v89_v15 = vsel %vm84_vm1, %v79_v14, 0  ;;  %v96_v23 = vadd.s32 %v95_v20, %v88_v6  ;;  %v1294_v61 = vld [vmem:[%s5705_s5 + $0x58] sm:$0xff]  ;;  %v3763_v8 = vpack.c.bf16 %v1289_v56, %v1287_v49 }
 0x266   :  { %v90_v16 = vadd.s32 %v89_v15, %v85_v47 }
 0x267   :  { %3447 = vmatmul.mubr.msk.f32.gmra.mrb[18].mxu1 %vm1136_vm7, %v981_v27  ;;  %v100_v26 = vadd.s32 %v96_v23, %v94_v22 }
 0x268   :  { %3449 = vmatprep.mubr.msk.f32.mxu1 %vm4183_vm6, %v4181_v7  ;;  %3744 = vmatpush1.bf16.msra.mxu1 %v3743_v29  ;;  %v98_v25 = vadd.s32 %v97_v24, %v90_v16 }
 0x269   :  { %3746 = vmatprep.subr.bf16.mxu1 %v3745_v30 }
 0x26a   :  { %v99_v27 = vadd.s32 %v98_v25, %v92_v21  ;;  %v3769_v25 = vpack.c.bf16 %v1298_v50, %v1296_v5 }
 0x26b   :  { %3450 = vmatmul.mubr.msk.f32.gmra.mrb[20].mxu1 %vm1136_vm7, %v982_v38  ;;  %v1285_v38 = vld [vmem:[%s5705_s5 + $0x10] sm:$0xff] }
 0x26c   :  { %3452 = vmatprep.mubr.msk.f32.mxu1 %vm4183_vm6, %v4181_v7  ;;  %3748 = vmatpush1.bf16.msra.mxu1 %v3747_v39  ;;  %v101_v29 = vadd.s32 %v100_v26, %v99_v27  ;;  %v1288_v39 = vld [vmem:[%s5705_s5 + $0x28] sm:$0xff]  ;;  %v1295_v26 = vld [vmem:[%s5705_s5 + $0x60] sm:$0xff]  ;;  %v1297_v27 = vld [vmem:[%s5705_s5 + $0x70] sm:$0xff] }
 0x26d   :  { %3750 = vmatprep.subr.bf16.mxu1 %v3749_v40  ;;  %v1290_v40 = vld [vmem:[%s5705_s5 + $0x38] sm:$0xff] }
 0x26e   :  { %v103_v30 = vshrl.u32 %v101_v29, 16  ;;  %v102_v31 = vand.u32 65535, %v101_v29  ;;  %v3761_v58 = vpack.c.bf16 %v1290_v40, %v1288_v39 }
 0x26f   :  { %3453 = vmatmul.mubr.msk.f32.gmra.mrb[22].mxu1 %vm1136_vm7, %v983_v45 }
 0x270   :  { %3455 = vmatprep.mubr.msk.f32.mxu1 %vm4183_vm6, %v4181_v7  ;;  %3752 = vmatpush1.bf16.msra.mxu1 %v3751_v46  ;;  %v105_v32 = vcvt.s32.f32 %v103_v30  ;;  %v104_v33 = vcvt.s32.f32 %v102_v31 }
 0x271   :  { %3754 = vmatprep.subr.bf16.mxu1 %v3753_v60  ;;  %v1292_v60 = vld [vmem:[%s5705_s5 + $0x48] sm:$0xff] }
 0x272   :  { %108 = vadd.xlane.f32.xlu0 %v105_v32  ;;  %106 = vadd.xlane.f32.xlu1 %v104_v33  ;;  %v3765_v37 = vpack.c.bf16 %v1294_v61, %v1292_v60  ;;  %v1300_v32 = vld [vmem:[%s5705_s5 + $0x88] sm:$0xff]  ;;  %v1302_v33 = vld [vmem:[%s5705_s5 + $0x98] sm:$0xff] }
 0x273   :  { %3456 = vmatmul.mubr.msk.f32.gmra.mrb[24].mxu1 %vm1136_vm7, %v984_v48  ;;  %v3759_v48 = vpack.c.bf16 %v1285_v38, %v1283_v36  ;;  %vm1252_vm7 = vcmask 687104   ;;  %v1304_v61 = vld [vmem:[%s5705_s5 + $0xa8] sm:$0xf] }
 0x274   :  { %1498 = vmatprep.mubr.f32.mxu1 %v4181_v7  ;;  %3756 = vmatpush1.bf16.msra.mxu1 %v3755_v0 }
 0x275   :  { %3260 = vmatprep.subr.msk.mxu1 %vm773_vm4, %v1400_v53 }
 0x278   :  { %3261 = vmatpush1.msk.msra.mxu1 %vm773_vm4, %v1398_v57 }
 0x279   :  { %3758 = vmatprep.subr.bf16.mxu1 %v3757_v9  ;;  %v1291_v9 = vld [vmem:[%s5705_s5 + $0x40] sm:$0xff] }
 0x27a   :  { %v3767_v17 = vpack.c.bf16 %v1293_v13, %v1291_v9  ;;  %v1629_v9 = vld [vmem:[%s5705_s5 + $0x168] sm:$0xff] }
 0x336   :  { %v4849_v34 = vpop.f32.mrb[16].mxu1 }
 0x337   :  { %v3445_v35 = vpop.f32.mrb[17].mxu1  ;;  %v1331_v42 = vrot.slane %v4849_v34, 1  ;;  %v1648_v43 = vrot.slane %v4849_v34, 2  ;;  %v1788_v45 = vrot.slane %v4849_v34, 3  ;;  %v2010_v57 = vrot.slane %v4849_v34, 4 }
 0x338   :  { %vm1242_vm9 = vcmp.ne.f32.partialorder %v4849_v34, 0.0 }
 0x339   :  { %v1247_v40 = vsel %vm1242_vm9, 1, %v4184_v10 }
 0x33a   :  { %v4866_v46 = vpop.f32.mrb[18].mxu1 }
 0x33b   :  { %v1332_v51 = vrot.slane %v4866_v46, 1  ;;  %v1649_v52 = vrot.slane %v4866_v46, 2  ;;  %v1789_v53 = vrot.slane %v4866_v46, 3  ;;  %v2011_v54 = vrot.slane %v4866_v46, 4  ;;  %v3448_v55 = vpop.f32.mrb[19].mxu1 }
 0x33c   :  { %vm1243_vm11 = vcmp.ne.f32.partialorder %v4866_v46, 0.0  ;;  %v1253_v55 = vsel %vm1252_vm7, %v1247_v40, 0  ;;  %v1640_v40 = vld [vmem:[%s5705_s5 + $0x1c0] sm:$0xff] }
 0x33d   :  { %v1333_v59 = vsel %vm147_vm0, %v1331_v42, %v1332_v51  ;;  %v4887_v63 = vsel %vm431_vm2, %v1648_v43, %v1649_v52  ;;  %v4890_v0 = vsel %vm602_vm3, %v1788_v45, %v1789_v53  ;;  %v4899_v11 = vsel %vm773_vm4, %v2010_v57, %v2011_v54 }
 0x33e   :  { %v4892_v3 = vpop.f32.mrb[20].mxu1  ;;  %3262 = vmatmul.mubr.msk.f32.vlgmr.msra.gmra.mrb[26].mxu1 %vm1252_vm7, %v1333_v59  ;;  %v3771_v45 = vpack.c.bf16 %v1297_v27, %v1295_v26  ;;  %v1248_v49 = vsel %vm1243_vm11, 1, %v4184_v10  ;;  %v1637_v26 = vld [vmem:[%s5705_s5 + $0x1a8] sm:$0xff]  ;;  %vm2879_vm11 = vcmask 80896  }
 0x33f   :  { %3760 = vmatpush1.bf16.msra.mxu1 %v3759_v48  ;;  %1504 = vmatprep.mubr.f32.mxu1 %v4181_v7  ;;  %v3451_v14 = vpop.f32.mrb[21].mxu1  ;;  %v1334_v12 = vrot.slane %v4892_v3, 1  ;;  %vm1244_vm8 = vcmp.ne.f32.partialorder %v4892_v3, 0.0  ;;  %v1651_v19 = vrot.slane %v4892_v3, 2  ;;  %v1791_v28 = vrot.slane %v4892_v3, 3 }
 0x340   :  { %3762 = vmatprep.subr.bf16.mxu1 %v3761_v58  ;;  %v1249_v41 = vsel %vm1244_vm8, 1, %v4184_v10  ;;  %v2013_v44 = vrot.slane %v4892_v3, 4  ;;  %v1254_v58 = vsel %vm1252_vm7, %v1248_v49, 0  ;;  %v1626_v14 = vld [vmem:[%s5705_s5 + $0x150] sm:$0xff]  ;;  %v1769_v49 = vld [vmem:[%s5705_s5 + $0x208] sm:$0xff] }
 0x341   :  { %v1335_v47 = vsel %vm147_vm0, %v1332_v51, %v1334_v12  ;;  %v4919_v6 = vsel %vm431_vm2, %v1649_v52, %v1651_v19  ;;  %v4922_v15 = vsel %vm602_vm3, %v1789_v53, %v1791_v28  ;;  %v1255_v18 = vsel %vm1252_vm7, %v1249_v41, 0  ;;  %v1299_v53 = vld [vmem:[%s5705_s5 + $0x80] sm:$0xff] }
 0x342   :  { %3263 = vmatmul.mubr.msk.f32.gmra.mrb[28].mxu1 %vm1252_vm7, %v1335_v47  ;;  %v4925_v16 = vpop.f32.mrb[22].mxu1  ;;  %v4930_v20 = vsel %vm773_vm4, %v2011_v54, %v2013_v44  ;;  %v3773_v52 = vpack.c.bf16 %v1302_v33, %v1300_v32  ;;  %v1301_v54 = vld [vmem:[%s5705_s5 + $0x90] sm:$0xff]  ;;  %v1633_v47 = vld [vmem:[%s5705_s5 + $0x188] sm:$0xff]  ;;  %v1636_v32 = vld [vmem:[%s5705_s5 + $0x1a0] sm:$0xff] }
 0x343   :  { %3764 = vmatpush1.bf16.msra.mxu1 %v3763_v8  ;;  %v3454_v21 = vpop.f32.mrb[23].mxu1  ;;  %1510 = vmatprep.mubr.f32.mxu1 %v4181_v7  ;;  %v1336_v22 = vrot.slane %v4925_v16, 1  ;;  %vm1245_vm10 = vcmp.ne.f32.partialorder %v4925_v16, 0.0  ;;  %v1653_v23 = vrot.slane %v4925_v16, 2  ;;  %v1793_v24 = vrot.slane %v4925_v16, 3  ;;  %v1627_v8 = vld [vmem:[%s5705_s5 + $0x158] sm:$0xff] }
 0x344   :  { %3766 = vmatprep.subr.bf16.mxu1 %v3765_v37  ;;  %v1250_v29 = vsel %vm1245_vm10, 1, %v4184_v10  ;;  %v2015_v30 = vrot.slane %v4925_v16, 4  ;;  %v3775_v59 = vpack.c.bf16 %v1301_v54, %v1299_v53  ;;  %v1632_v21 = vld [vmem:[%s5705_s5 + $0x180] sm:$0xff]  ;;  %v1641_v33 = vld [vmem:[%s5705_s5 + $0x1c8] sm:$0xff]  ;;  %v1766_v53 = vld [vmem:[%s5705_s5 + $0x1f0] sm:$0xf0] }
 0x345   :  { %v1337_v31 = vsel %vm147_vm0, %v1334_v12, %v1336_v22  ;;  %v1256_v35 = vsel %vm1252_vm7, %v1250_v29, 0  ;;  %v4957_v36 = vsel %vm431_vm2, %v1651_v19, %v1653_v23  ;;  %v4962_v38 = vsel %vm602_vm3, %v1791_v28, %v1793_v24  ;;  %v1628_v12 = vld [vmem:[%s5705_s5 + $0x160] sm:$0xff]  ;;  %v1770_v54 = vld [vmem:[%s5705_s5 + $0x210] sm:$0xff] }
 0x346   :  { %v1238_v39 = vpop.f32.mrb[24].mxu1  ;;  %3264 = vmatmul.mubr.msk.f32.gmra.mrb[30].mxu1 %vm1252_vm7, %v1337_v31  ;;  %v1261_v42 = vadd.s32 %v1256_v35, %v1255_v18  ;;  %v4971_v43 = vsel %vm773_vm4, %v2013_v44, %v2015_v30  ;;  %v1303_v19 = vld [vmem:[%s5705_s5 + $0xa0] sm:$0xf]  ;;  %v3777_v28 = vpack.c.bf16 %v1629_v9, %v1627_v8  ;;  %v1631_v44 = vld [vmem:[%s5705_s5 + $0x178] sm:$0xff]  ;;  %v3779_v5 = vpack.c.bf16 %v1628_v12, %v1626_v14  ;;  %v1630_v18 = vld [vmem:[%s5705_s5 + $0x170] sm:$0xff] }
 0x347   :  { %vm1246_vm13 = vcmp.ne.f32.partialorder %v1238_v39, 0.0  ;;  %3768 = vmatpush1.bf16.msra.mxu1 %v3767_v17  ;;  %1516 = vmatprep.mubr.f32.mxu1 %v4181_v7  ;;  %v3457_v48 = vpop.f32.mrb[25].mxu1  ;;  %v3783_v27 = vpack.c.bf16 %v1632_v21, %v1630_v18  ;;  %v1634_v31 = vld [vmem:[%s5705_s5 + $0x190] sm:$0xff]  ;;  %v1817_v9 = vrot.slane %v1766_v53, 4  ;;  %v1823_v12 = vrot.slane %v1770_v54, 4 }
 0x348   :  { %v1251_v51 = vsel %vm1246_vm13, 1, %v4184_v10  ;;  %3770 = vmatprep.subr.bf16.mxu1 %v3769_v25  ;;  %v1635_v25 = vld [vmem:[%s5705_s5 + $0x198] sm:$0xff]  ;;  %v3787_v35 = vpack.c.bf16 %v1636_v32, %v1634_v31  ;;  %v1638_v39 = vld [vmem:[%s5705_s5 + $0x1b0] sm:$0xff]  ;;  %v107_v31 = vpop.xlane.xlu1 %106  ;;  %vm2378_vm10 = vcmask 648192   ;;  %vm2959_vm13 = vcmask 975872  }
 0x349   :  { %v1258_v56 = vsel %vm1257_vm12, %v1251_v51, 0  ;;  %v3785_v29 = vpack.c.bf16 %v1637_v26, %v1635_v25  ;;  %v1767_v48 = vld [vmem:[%s5705_s5 + $0x1f8] sm:$0xf0]  ;;  %v1647_v21 = vld [vmem:[%s5705_s5 + $0x1f8] sm:$0xf]  ;;  %vm3003_vm12 = vcmask 982016  }
 0x34a   :  { %v1259_v57 = vadd.s32 %v1258_v56, %v1253_v55  ;;  %3265 = vmatmul.mubr.msk.f32.gmra.mrb[32].mxu1 %vm1252_vm7, %v1336_v22  ;;  %v3781_v22 = vpack.c.bf16 %v1633_v47, %v1631_v44  ;;  %v1771_v51 = vld [vmem:[%s5705_s5 + $0x218] sm:$0xff]  ;;  %v1773_v55 = vld [vmem:[%s5705_s5 + $0x228] sm:$0xff]  ;;  %v3791_v56 = vpack.c.bf16 %v1640_v40, %v1638_v39  ;;  %v110_v40 = vcvt.f32.s32 %v107_v31 }
 0x34b   :  { %3772 = vmatpush1.bf16.msra.mxu1 %v3771_v45  ;;  %1601 = vmatprep.mubr.f32.mxu1 %v4181_v7  ;;  %v1643_v45 = vld [vmem:[%s5705_s5 + $0x1d8] sm:$0xff]  ;;  %v1825_v8 = vrot.slane %v1771_v51, 4 }
 0x34c   :  { %v1260_v60 = vadd.s32 %v1259_v57, %v1254_v58  ;;  %3774 = vmatprep.subr.bf16.mxu1 %v3773_v52  ;;  %v1768_v52 = vld [vmem:[%s5705_s5 + $0x200] sm:$0xff]  ;;  %v1642_v58 = vld [vmem:[%s5705_s5 + $0x1d0] sm:$0xff]  ;;  %v1779_v47 = vld [vmem:[%s5705_s5 + $0x258] sm:$0xff] }
 0x34d   :  { %v1818_v14 = vrot.slane %v1768_v52, 4 }
 0x34e   :  { %v1262_v13 = vadd.s32 %v1261_v42, %v1260_v60  ;;  %v1820_v60 = vrot.slane %v1767_v48, 4  ;;  %v1646_v48 = vld [vmem:[%s5705_s5 + $0x1f0] sm:$0xf] }
 0x34f   :  { %3776 = vmatpush1.bf16.msra.mxu1 %v3775_v59  ;;  %v1644_v59 = vld [vmem:[%s5705_s5 + $0x1e0] sm:$0xff]  ;;  %v1824_v25 = vsel %vm773_vm4, %v1818_v14, %v1823_v12 }
 0x350   :  { %3266 = vmatprep.subr.msk.mxu1 %vm773_vm4, %v1304_v61  ;;  %v1264_v37 = vshrl.u32 %v1262_v13, 16  ;;  %v1263_v41 = vand.u32 65535, %v1262_v13  ;;  %v1821_v61 = vrot.slane %v1769_v49, 4  ;;  %v1829_v13 = vrot.slane %v1773_v55, 4 }
 0x351   :  { %v3795_v44 = vpack.c.bf16 %v1644_v59, %v1642_v58 }
 0x352   :  { %v1266_v50 = vcvt.s32.f32 %v1264_v37  ;;  %v1265_v17 = vcvt.s32.f32 %v1263_v41  ;;  %v1777_v41 = vld [vmem:[%s5705_s5 + $0x248] sm:$0xff]  ;;  %v1830_v26 = vsel %vm773_vm4, %v1825_v8, %v1829_v13 }
 0x353   :  { %3267 = vmatpush1.msk.msra.mxu1 %vm773_vm4, %v1303_v19  ;;  %v1772_v19 = vld [vmem:[%s5705_s5 + $0x220] sm:$0xff] }
 0x354   :  { %3268 = vmatmul.mubr.msk.f32.vlgmr.msra.gmra.mrb[26].mxu1 %vm1252_vm7, %v4849_v34  ;;  %3778 = vmatprep.subr.bf16.mxu1 %v3777_v28  ;;  %v1639_v34 = vld [vmem:[%s5705_s5 + $0x1b8] sm:$0xff]  ;;  %v1774_v28 = vld [vmem:[%s5705_s5 + $0x230] sm:$0xff] }
 0x355   :  { %3780 = vmatpush1.bf16.msra.mxu1 %v3779_v5  ;;  %1269 = vadd.xlane.f32.xlu0 %v1266_v50  ;;  %v3789_v42 = vpack.c.bf16 %v1641_v33, %v1639_v34  ;;  %v1822_v5 = vsel %vm773_vm4, %v1820_v60, %v1821_v61  ;;  %v1826_v50 = vsel %vm773_vm4, %v1821_v61, %v1825_v8  ;;  %v1831_v18 = vrot.slane %v1774_v28, 4  ;;  %v1776_v33 = vld [vmem:[%s5705_s5 + $0x240] sm:$0xff]  ;;  %v1782_v8 = vld [vmem:[%s5705_s5 + $0x270] sm:$0xff] }
 0x356   :  { %1267 = vadd.xlane.f32.xlu1 %v1265_v17  ;;  %1607 = vmatprep.mubr.f32.mxu1 %v4181_v7  ;;  %v1827_v17 = vrot.slane %v1772_v19, 4  ;;  %v1841_v34 = vrot.slane %v1779_v47, 4  ;;  %v1780_v60 = vld [vmem:[%s5705_s5 + $0x260] sm:$0xff]  ;;  %v1847_v47 = vrot.slane %v1782_v8, 4 }
 0x357   :  { %3782 = vmatprep.subr.bf16.mxu1 %v3781_v22  ;;  %v1819_v22 = vsel %vm773_vm4, %v1817_v9, %v1818_v14  ;;  %v1785_v14 = vld [vmem:[%s5705_s5 + $0x288] sm:$0xff]  ;;  %v1996_v8 = vld [vmem:[%s5705_s5 + $0x2e0] sm:$0xff] }
 0x358   :  { %3269 = vmatmul.mubr.msk.f32.gmra.mrb[28].mxu1 %vm1252_vm7, %v4866_v46  ;;  %v1645_v46 = vld [vmem:[%s5705_s5 + $0x1e8] sm:$0xff]  ;;  %v3799_v49 = vpack.c.bf16 %v1824_v25, %v1819_v22  ;;  %v1828_v51 = vsel %vm773_vm4, %v1823_v12, %v1827_v17  ;;  %v1832_v52 = vsel %vm773_vm4, %v1827_v17, %v1831_v18  ;;  %v1787_v12 = vld [vmem:[%s5705_s5 + $0x298] sm:$0xff] }
 0x359   :  { %3784 = vmatpush1.bf16.msra.mxu1 %v3783_v27  ;;  %1613 = vmatprep.mubr.f32.mxu1 %v4181_v7  ;;  %v3793_v57 = vpack.c.bf16 %v1645_v46, %v1643_v45  ;;  %v1837_v27 = vrot.slane %v1777_v41, 4  ;;  %v1781_v45 = vld [vmem:[%s5705_s5 + $0x268] sm:$0xff]  ;;  %v1783_v46 = vld [vmem:[%s5705_s5 + $0x278] sm:$0xff]  ;;  %v3803_v9 = vpack.c.bf16 %v1832_v52, %v1828_v51  ;;  %v1857_v17 = vrot.slane %v1787_v12, 4  ;;  %v1988_v51 = vld [vmem:[%s5705_s5 + $0x2a0] sm:$0xff] }
 0x35a   :  { %3786 = vmatprep.subr.bf16.mxu1 %v3785_v29  ;;  %v109_v29 = vpop.xlane.xlu0 %108  ;;  %v1845_v58 = vrot.slane %v1781_v45, 4  ;;  %v1849_v59 = vrot.slane %v1783_v46, 4  ;;  %v1993_v52 = vld [vmem:[%s5705_s5 + $0x2c8] sm:$0xff] }
 0x35b   :  { %v111_v39 = vcvt.f32.s32 %v109_v29 }
 0x35c   :  { %3270 = vmatmul.mubr.msk.f32.gmra.mrb[30].mxu1 %vm1252_vm7, %v4892_v3  ;;  %v1775_v3 = vld [vmem:[%s5705_s5 + $0x238] sm:$0xff]  ;;  %v1846_v41 = vsel %vm773_vm4, %v1841_v34, %v1845_v58 }
 0x35d   :  { %3788 = vmatpush1.bf16.msra.mxu1 %v3787_v35  ;;  %1619 = vmatprep.mubr.f32.mxu1 %v4181_v7  ;;  %v1833_v37 = vrot.slane %v1775_v3, 4  ;;  %v1778_v35 = vld [vmem:[%s5705_s5 + $0x250] sm:$0xff]  ;;  %v112_v53 = vshll.u32 %v111_v39, 16 }
 0x35e   :  { %3790 = vmatprep.subr.bf16.mxu1 %v3789_v42  ;;  %v3797_v42 = vpack.c.bf16 %v1826_v50, %v1822_v5  ;;  %v1839_v3 = vrot.slane %v1778_v35, 4  ;;  %v1853_v50 = vrot.slane %v1785_v14, 4  ;;  %v2001_v14 = vld [vmem:[%s5705_s5 + $0x308] sm:$0xff] }
 0x35f   :  { %v1834_v32 = vsel %vm773_vm4, %v1829_v13, %v1833_v37  ;;  %v1838_v55 = vsel %vm773_vm4, %v1833_v37, %v1837_v27  ;;  %v113_v61 = vadd.s32 %v112_v53, %v110_v40  ;;  %v1995_v53 = vld [vmem:[%s5705_s5 + $0x2d8] sm:$0xff] }
 0x360   :  { %3271 = vmatmul.mubr.msk.f32.gmra.mrb[32].mxu1 %vm1252_vm7, %v4925_v16  ;;  %v3801_v54 = vpack.c.bf16 %v1834_v32, %v1830_v26  ;;  %v1858_v35 = vsel %vm773_vm4, %v1853_v50, %v1857_v17 }
 0x361   :  { %3792 = vmatpush1.bf16.msra.mxu1 %v3791_v56  ;;  %1733 = vmatprep.mubr.f32.mxu1 %v4181_v7  ;;  %v1835_v56 = vrot.slane %v1776_v33, 4  ;;  %v114_v13 = vrot.slane %v113_v61, 4  ;;  %v1854_v33 = vsel %vm773_vm4, %v1849_v59, %v1853_v50  ;;  %v2008_v50 = vld [vmem:[%s5705_s5 + $0x340] sm:$0xf] }
 0x362   :  { %3794 = vmatprep.subr.bf16.mxu1 %v3793_v57  ;;  %v1842_v57 = vsel %vm773_vm4, %v1837_v27, %v1841_v34  ;;  %v3813_v40 = vpack.c.bf16 %v1858_v35, %v1854_v33  ;;  %v2171_v35 = vld [vmem:[%s5708_s8 + $0x60] sm:$0xff] }
 0x363   :  { %v3805_v19 = vpack.c.bf16 %v1842_v57, %v1838_v55  ;;  %v1836_v28 = vsel %vm773_vm4, %v1831_v18, %v1835_v56  ;;  %v1840_v37 = vsel %vm773_vm4, %v1835_v56, %v1839_v3  ;;  %v115_v5 = vadd.s32 %v114_v13, %v113_v61  ;;  %v1786_v18 = vld [vmem:[%s5705_s5 + $0x290] sm:$0xff] }
 0x364   :  { %v3807_v25 = vpack.c.bf16 %v1840_v37, %v1836_v28  ;;  %v1855_v32 = vrot.slane %v1786_v18, 4  ;;  %v3821_v56 = vpack.c.bf16 %v1995_v53, %v1993_v52  ;;  %v1994_v57 = vld [vmem:[%s5705_s5 + $0x2d0] sm:$0xff]  ;;  %v2005_v37 = vld [vmem:[%s5705_s5 + $0x328] sm:$0xff]  ;;  %v2175_v52 = vld [vmem:[%s5708_s8 + $0x80] sm:$0xff] }
 0x365   :  { %3796 = vmatpush1.bf16.msra.mxu1 %v3795_v44  ;;  %v1850_v44 = vsel %vm773_vm4, %v1845_v58, %v1849_v59  ;;  %v116_v22 = vrot.slane %v115_v5, 2  ;;  %v1997_v58 = vld [vmem:[%s5705_s5 + $0x2e8] sm:$0xff]  ;;  %v1999_v59 = vld [vmem:[%s5705_s5 + $0x2f8] sm:$0xff]  ;;  %v2002_v28 = vld [vmem:[%s5705_s5 + $0x310] sm:$0xff] }
 0x366   :  { %3272 = vmatprep.subr.msk.mxu1 %vm773_vm4, %v1647_v21  ;;  %v1784_v21 = vld [vmem:[%s5705_s5 + $0x280] sm:$0xff]  ;;  %v3809_v26 = vpack.c.bf16 %v1850_v44, %v1846_v41  ;;  %v3825_v61 = vpack.c.bf16 %v1999_v59, %v1997_v58  ;;  %v2176_v53 = vld [vmem:[%s5708_s8 + $0x88] sm:$0xff] }
 0x367   :  { %v1851_v31 = vrot.slane %v1784_v21, 4  ;;  %v117_v34 = vadd.s32 %v116_v22, %v115_v5  ;;  %v2004_v44 = vld [vmem:[%s5705_s5 + $0x320] sm:$0xff]  ;;  %v2009_v5 = vld [vmem:[%s5705_s5 + $0x348] sm:$0xf]  ;;  %v2165_v22 = vld [vmem:[%s5708_s8 + $0x30] sm:$0xff] }
 0x368   :  { %v2164_v21 = vld [vmem:[%s5708_s8 + $0x28] sm:$0xff] }
 0x369   :  { %3273 = vmatpush1.msk.msra.mxu1 %vm773_vm4, %v1646_v48  ;;  %v1856_v45 = vsel %vm773_vm4, %v1851_v31, %v1855_v32 }
 0x36a   :  { %3274 = vmatmul.mubr.msk.f32.vlgmr.msra.gmra.mrb[26].mxu1 %vm1252_vm7, %v4887_v63  ;;  %3798 = vmatprep.subr.bf16.mxu1 %v3797_v42  ;;  %v1843_v63 = vrot.slane %v1780_v60, 4  ;;  %v1852_v42 = vsel %vm773_vm4, %v1847_v47, %v1851_v31 }
 0x36b   :  { %3800 = vmatpush1.bf16.msra.mxu1 %v3799_v49  ;;  %1739 = vmatprep.mubr.f32.mxu1 %v4181_v7  ;;  %v3815_v48 = vpack.c.bf16 %v1856_v45, %v1852_v42  ;;  %v1991_v49 = vld [vmem:[%s5705_s5 + $0x2b8] sm:$0xff] }
 0x36c   :  { %3802 = vmatprep.subr.bf16.mxu1 %v3801_v54  ;;  %v1844_v27 = vsel %vm773_vm4, %v1839_v3, %v1843_v63  ;;  %v1848_v29 = vsel %vm773_vm4, %v1843_v63, %v1847_v47  ;;  %v1992_v3 = vld [vmem:[%s5705_s5 + $0x2c0] sm:$0xff]  ;;  %v2006_v47 = vld [vmem:[%s5705_s5 + $0x330] sm:$0xff]  ;;  %v2174_v42 = vld [vmem:[%s5708_s8 + $0x78] sm:$0xff] }
 0x36d   :  { %v3811_v39 = vpack.c.bf16 %v1848_v29, %v1844_v27  ;;  %v3823_v60 = vpack.c.bf16 %v1994_v57, %v1992_v3  ;;  %v2167_v27 = vld [vmem:[%s5708_s8 + $0x40] sm:$0xff]  ;;  %v2168_v29 = vld [vmem:[%s5708_s8 + $0x48] sm:$0xff]  ;;  %v2177_v3 = vld [vmem:[%s5708_s8 + $0x90] sm:$0xff] }
 0x36e   :  { %3275 = vmatmul.mubr.msk.f32.gmra.mrb[28].mxu1 %vm1252_vm7, %v4919_v6  ;;  %v118_v6 = vrot.slane %v117_v34, 1  ;;  %v3850_v31 = vpack.c.bf16 %v2168_v29, %v2167_v27  ;;  %v2178_v57 = vld [vmem:[%s5708_s8 + $0x98] sm:$0xff] }
 0x36f   :  { %3804 = vmatpush1.bf16.msra.mxu1 %v3803_v9  ;;  %1745 = vmatprep.mubr.f32.mxu1 %v4181_v7  ;;  %v1998_v9 = vld [vmem:[%s5705_s5 + $0x2f0] sm:$0xff]  ;;  %v3865_v58 = vpack.c.bf16 %v2178_v57, %v2177_v3  ;;  %v2405_v27 = vld [vmem:[%s5709_s9 + $0x18] sm:$0xff]  ;;  %v2414_v57 = vld [vmem:[%s5709_s9 + $0x60] sm:$0xff] }
 0x370   :  { %3806 = vmatprep.subr.bf16.mxu1 %v3805_v19  ;;  %v119_v46 = vadd.s32 %v118_v6, %v117_v34  ;;  %v3827_v12 = vpack.c.bf16 %v1998_v9, %v1996_v8  ;;  %v2000_v19 = vld [vmem:[%s5705_s5 + $0x300] sm:$0xff]  ;;  %v2170_v34 = vld [vmem:[%s5708_s8 + $0x58] sm:$0xff]  ;;  %v2172_v6 = vld [vmem:[%s5708_s8 + $0x68] sm:$0xff] }
 0x371   :  { %v3831_v63 = vpack.c.bf16 %v2002_v28, %v2000_v19  ;;  %v2128_v9 = vld [vmem:[%s5706_s6] sm:$0x3] }
 0x372   :  { %3276 = vmatmul.mubr.msk.f32.gmra.mrb[30].mxu1 %vm1252_vm7, %v4957_v36  ;;  %4118 = vpush %v119_v46  ;;  %v1989_v36 = vld [vmem:[%s5705_s5 + $0x2a8] sm:$0xff] }
 0x373   :  { %3808 = vmatpush1.bf16.msra.mxu1 %v3807_v25  ;;  %1751 = vmatprep.mubr.f32.mxu1 %v4181_v7  ;;  %v3817_v54 = vpack.c.bf16 %v1991_v49, %v1989_v36  ;;  %v2166_v25 = vld [vmem:[%s5708_s8 + $0x38] sm:$0xff] }
 0x374   :  { %3810 = vmatprep.subr.bf16.mxu1 %v3809_v26  ;;  %v3847_v26 = vpack.c.bf16 %v2166_v25, %v2165_v22  ;;  %v2403_v22 = vld [vmem:[%s5709_s9 + $0x8] sm:$0xff]  ;;  %v2404_v25 = vld [vmem:[%s5709_s9 + $0x10] sm:$0xff] }
 0x375   :  { %v3898_v29 = vpack.c.bf16 %v2405_v27, %v2404_v25 }
 0x376   :  { %3277 = vmatmul.mubr.msk.f32.gmra.mrb[32].mxu1 %vm1252_vm7, %v1653_v23  ;;  %v1990_v23 = vld [vmem:[%s5705_s5 + $0x2b0] sm:$0xff] }
 0x377   :  { %3812 = vmatpush1.bf16.msra.mxu1 %v3811_v39  ;;  %1955 = vmatprep.mubr.f32.mxu1 %v4181_v7  ;;  %v3819_v55 = vpack.c.bf16 %v1990_v23, %v1988_v51  ;;  %v3856_v39 = vpack.c.bf16 %v2172_v6, %v2171_v35  ;;  %v2409_v35 = vld [vmem:[%s5709_s9 + $0x38] sm:$0xff] }
 0x378   :  { %3814 = vmatprep.subr.bf16.mxu1 %v3813_v40  ;;  %v2173_v40 = vld [vmem:[%s5708_s8 + $0x70] sm:$0xff] }
 0x379   :  { %v3859_v45 = vpack.c.bf16 %v2174_v42, %v2173_v40  ;;  %v2411_v40 = vld [vmem:[%s5709_s9 + $0x48] sm:$0xff] }
 0x37b   :  { %3816 = vmatpush1.bf16.msra.mxu1 %v3815_v48 }
 0x37c   :  { %3278 = vmatprep.subr.msk.mxu1 %vm773_vm4, %v1857_v17 }
 0x37f   :  { %3279 = vmatpush1.msk.msra.mxu1 %vm773_vm4, %v1855_v32  ;;  %v2169_v32 = vld [vmem:[%s5708_s8 + $0x50] sm:$0xff] }
 0x380   :  { %3280 = vmatmul.mubr.msk.f32.vlgmr.msra.gmra.mrb[26].mxu1 %vm1252_vm7, %v4890_v0  ;;  %3818 = vmatprep.subr.bf16.mxu1 %v3817_v54  ;;  %v2003_v0 = vld [vmem:[%s5705_s5 + $0x318] sm:$0xff]  ;;  %v3853_v33 = vpack.c.bf16 %v2170_v34, %v2169_v32  ;;  %v3862_v54 = vpack.c.bf16 %v2176_v53, %v2175_v52  ;;  %v2407_v32 = vld [vmem:[%s5709_s9 + $0x28] sm:$0xff]  ;;  %v2412_v52 = vld [vmem:[%s5709_s9 + $0x50] sm:$0xff] }
 0x381   :  { %3820 = vmatpush1.bf16.msra.mxu1 %v3819_v55  ;;  %1961 = vmatprep.mubr.f32.mxu1 %v4181_v7  ;;  %v3829_v13 = vpack.c.bf16 %v2003_v0, %v2001_v14  ;;  %v2133_v14 = vrot.slane %v2128_v9, %v940_v2  ;;  %v2137_v0 = vrot.slane %v2128_v9, %v944_v4  ;;  %v2413_v53 = vld [vmem:[%s5709_s9 + $0x58] sm:$0xff]  ;;  %v2157_v9 = vld [vmem:[%s5707_s7 + $0x8] sm:$0xff] }
 0x382   :  { %3822 = vmatprep.subr.bf16.mxu1 %v3821_v56 }
 0x384   :  { %3281 = vmatmul.mubr.msk.f32.gmra.mrb[28].mxu1 %vm1252_vm7, %v4922_v15  ;;  %v2007_v15 = vld [vmem:[%s5705_s5 + $0x338] sm:$0xff] }
 0x385   :  { %3824 = vmatpush1.bf16.msra.mxu1 %v3823_v60  ;;  %1967 = vmatprep.mubr.f32.mxu1 %v4181_v7  ;;  %v3833_v41 = vpack.c.bf16 %v2007_v15, %v2005_v37 }
 0x386   :  { %3826 = vmatprep.subr.bf16.mxu1 %v3825_v61 }
 0x388   :  { %3282 = vmatmul.mubr.msk.f32.gmra.mrb[30].mxu1 %vm1252_vm7, %v4962_v38  ;;  %v3835_v38 = vpack.c.bf16 %v2006_v47, %v2004_v44 }
 0x389   :  { %3828 = vmatpush1.bf16.msra.mxu1 %v3827_v12  ;;  %1973 = vmatprep.mubr.f32.mxu1 %v4181_v7 }
 0x38a   :  { %3830 = vmatprep.subr.bf16.mxu1 %v3829_v13 }
 0x38c   :  { %3283 = vmatmul.mubr.msk.f32.gmra.mrb[32].mxu1 %vm1252_vm7, %v1793_v24  ;;  %v2160_v24 = vld [vmem:[%s5708_s8 + $0x8] sm:$0xff] }
 0x38d   :  { %3832 = vmatpush1.bf16.msra.mxu1 %v3831_v63  ;;  %2095 = vmatprep.mubr.f32.mxu1 %v4181_v7 }
 0x38e   :  { %3834 = vmatprep.subr.bf16.mxu1 %v3833_v41 }
 0x391   :  { %3836 = vmatpush1.bf16.msra.mxu1 %v3835_v38 }
 0x392   :  { %3284 = vmatprep.subr.msk.mxu1 %vm773_vm4, %v2009_v5 }
 0x395   :  { %3285 = vmatpush1.msk.msra.mxu1 %vm773_vm4, %v2008_v50 }
 0x396   :  { %3286 = vmatmul.mubr.msk.f32.vlgmr.msra.gmra.mrb[26].mxu1 %vm1252_vm7, %v4899_v11  ;;  %v2159_v11 = vld [vmem:[%s5708_s8] sm:$0xff] }
 0x397   :  { %2101 = vmatprep.mubr.f32.mxu1 %v4181_v7  ;;  %v3838_v17 = vpack.c.bf16 %v2160_v24, %v2159_v11 }
 0x399   :  { %3839 = vmatpush1.bf16.msra.mxu0 %v3838_v17 }
 0x39a   :  { %3287 = vmatmul.mubr.msk.f32.gmra.mrb[28].mxu1 %vm1252_vm7, %v4930_v20  ;;  %v2161_v20 = vld [vmem:[%s5708_s8 + $0x10] sm:$0xff]  ;;  %3840 = vmatprep.subr.bf16.mxu0 %v4182_v62 }
 0x39b   :  { %2107 = vmatprep.mubr.f32.mxu1 %v4181_v7 }
 0x39e   :  { %3288 = vmatmul.mubr.msk.f32.gmra.mrb[30].mxu1 %vm1252_vm7, %v4971_v43  ;;  %v2162_v43 = vld [vmem:[%s5708_s8 + $0x18] sm:$0xff] }
 0x39f   :  { %2113 = vmatprep.mubr.f32.mxu1 %v4181_v7  ;;  %v3841_v16 = vpack.c.bf16 %v2162_v43, %v2161_v20 }
 0x3a1   :  { %3842 = vmatpush1.bf16.msra.mxu0 %v3841_v16 }
 0x3a2   :  { %3289 = vmatmul.mubr.msk.f32.gmra.mrb[32].mxu1 %vm1252_vm7, %v2015_v30  ;;  %v2163_v30 = vld [vmem:[%s5708_s8 + $0x20] sm:$0xff]  ;;  %3843 = vmatprep.subr.bf16.mxu0 %v4182_v62 }
 0x3a3   :  { %v3844_v18 = vpack.c.bf16 %v2164_v21, %v2163_v30 }
 0x3a5   :  { %3845 = vmatpush1.bf16.msra.mxu0 %v3844_v18  ;;  %v2402_v18 = vld [vmem:[%s5709_s9] sm:$0xff] }
 0x3a6   :  { %3846 = vmatprep.subr.bf16.mxu0 %v4182_v62 }
 0x3a9   :  { %3848 = vmatpush1.bf16.msra.mxu0 %v3847_v26  ;;  %v3894_v26 = vpack.c.bf16 %v2403_v22, %v2402_v18 }
 0x3aa   :  { %3849 = vmatprep.subr.bf16.mxu0 %v4182_v62 }
 0x3ab   :  { %3895 = vmatprep.subr.bf16.mxu1 %v3894_v26 }
 0x3ac   :  { %3897 = vmatpush3.bf16.msra.mxu1 %v3894_v26 }
 0x3ad   :  { %3851 = vmatpush1.bf16.msra.mxu0 %v3850_v31  ;;  %v2406_v31 = vld [vmem:[%s5709_s9 + $0x20] sm:$0xff]  ;;  %3899 = vmatprep.subr.bf16.mxu1 %v3898_v29 }
 0x3ae   :  { %3852 = vmatprep.subr.bf16.mxu0 %v4182_v62  ;;  %v3902_v34 = vpack.c.bf16 %v2407_v32, %v2406_v31 }
 0x3b0   :  { %3901 = vmatpush3.bf16.msra.mxu1 %v3898_v29 }
 0x3b1   :  { %3854 = vmatpush1.bf16.msra.mxu0 %v3853_v33  ;;  %v2408_v33 = vld [vmem:[%s5709_s9 + $0x30] sm:$0xff]  ;;  %3903 = vmatprep.subr.bf16.mxu1 %v3902_v34 }
 0x3b2   :  { %3855 = vmatprep.subr.bf16.mxu0 %v4182_v62  ;;  %v3906_v6 = vpack.c.bf16 %v2409_v35, %v2408_v33 }
 0x3b4   :  { %3905 = vmatpush3.bf16.msra.mxu1 %v3902_v34 }
 0x3b5   :  { %3857 = vmatpush1.bf16.msra.mxu0 %v3856_v39  ;;  %v2410_v39 = vld [vmem:[%s5709_s9 + $0x40] sm:$0xff]  ;;  %3907 = vmatprep.subr.bf16.mxu1 %v3906_v6 }
 0x3b6   :  { %3858 = vmatprep.subr.bf16.mxu0 %v4182_v62  ;;  %v3910_v42 = vpack.c.bf16 %v2411_v40, %v2410_v39  ;;  %v2591_v39 = vld [vmem:[%s5709_s9 + $0xd0] sm:$0xff]  ;;  %v2592_v40 = vld [vmem:[%s5709_s9 + $0xd8] sm:$0xff] }
 0x3b8   :  { %3909 = vmatpush3.bf16.msra.mxu1 %v3906_v6 }
 0x3b9   :  { %3860 = vmatpush1.bf16.msra.mxu0 %v3859_v45  ;;  %3911 = vmatprep.subr.bf16.mxu1 %v3910_v42 }
 0x3ba   :  { %3861 = vmatprep.subr.bf16.mxu0 %v4182_v62 }
 0x3bc   :  { %3913 = vmatpush3.bf16.msra.mxu1 %v3910_v42 }
 0x3bd   :  { %3863 = vmatpush1.bf16.msra.mxu0 %v3862_v54 }
 0x3be   :  { %3864 = vmatprep.subr.bf16.mxu0 %v4182_v62 }
 0x3c1   :  { %3866 = vmatpush1.bf16.msra.mxu0 %v3865_v58  ;;  %v2415_v58 = vld [vmem:[%s5709_s9 + $0x68] sm:$0xff] }
 0x3c2   :  { %3867 = vmatprep.subr.bf16.mxu0 %v4182_v62 }
 0x3e2   :  { %v1270_v46 = vpop.xlane.xlu0 %1269 }
 0x3e3   :  { %v1272_v48 = vcvt.f32.s32 %v1270_v46  ;;  %v1268_v36 = vpop.xlane.xlu1 %1267 }
 0x3e4   :  { %v1271_v51 = vcvt.f32.s32 %v1268_v36 }
 0x3e5   :  { %v1273_v49 = vshll.u32 %v1272_v48, 16 }
 0x3e7   :  { %v1274_v23 = vadd.s32 %v1273_v49, %v1271_v51 }
 0x3e9   :  { %v1275_v55 = vrot.slane %v1274_v23, 4 }
 0x3eb   :  { %v1276_v56 = vadd.s32 %v1275_v55, %v1274_v23  ;;  %v3874_v55 = vpack.c.bf16 %v2413_v53, %v2412_v52 }
 0x3ed   :  { %v1277_v59 = vrot.slane %v1276_v56, 2 }
 0x3ef   :  { %v1278_v60 = vadd.s32 %v1277_v59, %v1276_v56  ;;  %v2156_v59 = vld [vmem:[%s5707_s7] sm:$0xff] }
 0x3f1   :  { %v1279_v61 = vrot.slane %v1278_v60, 1 }
 0x3f3   :  { %v1280_v8 = vadd.s32 %v1279_v61, %v1278_v60  ;;  %v3878_v60 = vpack.c.bf16 %v2415_v58, %v2414_v57  ;;  %v2416_v61 = vld [vmem:[%s5709_s9 + $0x70] sm:$0xff]  ;;  %v2680_v57 = vld [vmem:[%s5709_s9 + $0xf8] sm:$0xff] }
 0x3f5   :  { %4120 = vpush %v1280_v8  ;;  %v2417_v8 = vld [vmem:[%s5709_s9 + $0x78] sm:$0xff] }
 0x469   :  { %v2097_v12 = vpop.f32.mrb[26].mxu1 }
 0x46a   :  { %v2140_v13 = vadd.f32 %v2133_v14, %v2097_v12  ;;  %v2099_v19 = vpop.f32.mrb[27].mxu1  ;;  %v2418_v12 = vld [vmem:[%s5709_s9 + $0x80] sm:$0xff] }
 0x46b   :  { %v2141_v28 = vadd.f32 %v2137_v0, %v2099_v19 }
 0x46c   :  { %v2148_v63 = vmax.f32 %v2140_v13, 0.0  ;;  %v2419_v13 = vld [vmem:[%s5709_s9 + $0x88] sm:$0xff] }
 0x46d   :  { %v2149_v37 = vmax.f32 %v2141_v28, 0.0  ;;  %v2103_v15 = vpop.f32.mrb[28].mxu1  ;;  %v3886_v19 = vpack.c.bf16 %v2419_v13, %v2418_v12  ;;  %v2585_v28 = vld [vmem:[%s5709_s9 + $0xa0] sm:$0xff]  ;;  %v2686_v12 = vld [vmem:[%s5709_s9 + $0x128] sm:$0xff] }
 0x46e   :  { %v2142_v41 = vadd.f32 %v2133_v14, %v2103_v15  ;;  %v2105_v44 = vpop.f32.mrb[29].mxu1 }
 0x46f   :  { %v2143_v47 = vadd.f32 %v2137_v0, %v2105_v44  ;;  %3290 = vmatprep.mubr.msk.f32.mxu0 %vm84_vm1, %v2149_v37  ;;  %v2586_v37 = vld [vmem:[%s5709_s9 + $0xa8] sm:$0xff] }
 0x470   :  { %2256 = vmatmul.mubr.f32.vlgmr.msra.gmra.mrb[16].mxu0 %v2148_v63  ;;  %v2150_v50 = vmax.f32 %v2142_v41, 0.0  ;;  %v3914_v15 = vpack.c.bf16 %v2586_v37, %v2585_v28  ;;  %v2420_v63 = vld [vmem:[%s5709_s9 + $0x90] sm:$0xff]  ;;  %v2421_v41 = vld [vmem:[%s5709_s9 + $0x98] sm:$0xff] }
 0x471   :  { %v2151_v38 = vmax.f32 %v2143_v47, 0.0  ;;  %v2109_v5 = vpop.f32.mrb[30].mxu1  ;;  %v3890_v44 = vpack.c.bf16 %v2421_v41, %v2420_v63  ;;  %v2688_v28 = vld [vmem:[%s5709_s9 + $0x138] sm:$0xff]  ;;  %v2774_v63 = vld [vmem:[%s5709_s9 + $0x148] sm:$0xff] }
 0x472   :  { %v2144_v2 = vadd.f32 %v2133_v14, %v2109_v5  ;;  %v2111_v11 = vpop.f32.mrb[31].mxu1  ;;  %3915 = vmatprep.subr.bf16.mxu1 %v3914_v15  ;;  %v2588_v5 = vld [vmem:[%s5709_s9 + $0xb8] sm:$0xff] }
 0x473   :  { %v2145_v1 = vadd.f32 %v2137_v0, %v2111_v11  ;;  %3291 = vmatprep.mubr.msk.f32.mxu0 %vm84_vm1, %v2151_v38  ;;  %v2587_v38 = vld [vmem:[%s5709_s9 + $0xb0] sm:$0xff]  ;;  %v2590_v11 = vld [vmem:[%s5709_s9 + $0xc8] sm:$0xff] }
 0x474   :  { %2261 = vmatmul.mubr.f32.gmra.mrb[18].mxu0 %v2150_v50  ;;  %v2152_v20 = vmax.f32 %v2144_v2, 0.0  ;;  %v2589_v2 = vld [vmem:[%s5709_s9 + $0xc0] sm:$0xff] }
 0x475   :  { %v2153_v4 = vmax.f32 %v2145_v1, 0.0  ;;  %v2115_v24 = vpop.f32.mrb[32].mxu1 }
 0x476   :  { %v2146_v17 = vadd.f32 %v2133_v14, %v2115_v24  ;;  %v2117_v43 = vpop.f32.mrb[33].mxu1  ;;  %v3882_v14 = vpack.c.bf16 %v2417_v8, %v2416_v61  ;;  %v2683_v8 = vld [vmem:[%s5709_s9 + $0x110] sm:$0xff] }
 0x477   :  { %v2147_v16 = vadd.f32 %v2137_v0, %v2117_v43  ;;  %3292 = vmatprep.mubr.msk.f32.mxu0 %vm84_vm1, %v2153_v4  ;;  %v2158_v0 = vld [vmem:[%s5707_s7 + $0x10] sm:$0x3]  ;;  %v3918_v4 = vpack.c.bf16 %v2588_v5, %v2587_v38  ;;  %v3922_v43 = vpack.c.bf16 %v2590_v11, %v2589_v2  ;;  %v2777_v5 = vld [vmem:[%s5709_s9 + $0x160] sm:$0xff]  ;;  %s4119_s7 = spop %4118 }
 0x478   :  { %2266 = vmatmul.mubr.f32.gmra.mrb[20].mxu0 %v2152_v20  ;;  %v2154_v21 = vmax.f32 %v2146_v17, 0.0  ;;  %v2779_v11 = vld [vmem:[%s5709_s9 + $0x170] sm:$0xff] }
 0x479   :  { %v2155_v30 = vmax.f32 %v2147_v16, 0.0 }
 0x47b   :  { %3293 = vmatprep.mubr.msk.f32.mxu0 %vm84_vm1, %v2155_v30  ;;  %vm4185_vm1 = vmmov 1  }
 0x47c   :  { %2271 = vmatmul.mubr.f32.gmra.mrb[22].mxu0 %v2154_v21  ;;  %vm3872_vm14 = vmpackc.low %vm773_vm4, %vm4185_vm1 }
 0x47d   :  { %3466 = vmatprep.mubr.msk.f32.mxu0 %vm4183_vm6, %v4181_v7 }
 0x543   :  { %v2257_v45 = vpop.f32.mrb[16].mxu0 }
 0x544   :  { %v2259_v46 = vpop.f32.mrb[17].mxu0 }
 0x547   :  { %v2262_v48 = vpop.f32.mrb[18].mxu0 }
 0x548   :  { %v3868_v36 = vpack.c.bf16 %v2262_v48, %v2257_v45  ;;  %v2264_v49 = vpop.f32.mrb[19].mxu0 }
 0x54a   :  { %3869 = vmatpush3.bf16.msra.mxu0 %v3868_v36  ;;  %v3926_v36 = vpack.c.bf16 %v2592_v40, %v2591_v39 }
 0x54b   :  { %v2267_v51 = vpop.f32.mrb[20].mxu0  ;;  %3870 = vmatprep.subr.bf16.mxu0 %v4182_v62 }
 0x54c   :  { %v2269_v23 = vpop.f32.mrb[21].mxu0 }
 0x54d   :  { %v2594_v23 = vld [vmem:[%s5709_s9 + $0xe8] sm:$0xff] }
 0x54f   :  { %v2272_v54 = vpop.f32.mrb[22].mxu0 }
 0x550   :  { %v3871_v56 = vpack.c.bf16 %v2272_v54, %v2267_v51  ;;  %v2274_v3 = vpop.f32.mrb[23].mxu0  ;;  %v2593_v51 = vld [vmem:[%s5709_s9 + $0xe0] sm:$0xff] }
 0x551   :  { %v3930_v54 = vpack.c.bf16 %v2594_v23, %v2593_v51  ;;  %v2679_v3 = vld [vmem:[%s5709_s9 + $0xf0] sm:$0xff]  ;;  %v2982_v51 = vld [vmem:[%s5712_s12 + $0x8] sm:$0xff] }
 0x552   :  { %3873 = vmatpush3.bf16.msk.msra.mxu0 %vm3872_vm14, %v3871_v56  ;;  %v3934_v58 = vpack.c.bf16 %v2680_v57, %v2679_v3  ;;  %v2985_v3 = vld [vmem:[%s5712_s12 + $0x20] sm:$0xff]  ;;  %v2986_v57 = vld [vmem:[%s5712_s12 + $0x28] sm:$0xff] }
 0x553   :  { %3875 = vmatprep.subr.bf16.mxu0 %v3874_v55 }
 0x555   :  { %3467 = vmatmul.mubr.msk.f32.vlgmr.msra.gmra.mrb[24].mxu0 %vm2276_vm15, %v2156_v59  ;;  %v2681_v59 = vld [vmem:[%s5709_s9 + $0x100] sm:$0xff] }
 0x556   :  { %3469 = vmatprep.mubr.msk.f32.mxu0 %vm4183_vm6, %v4181_v7  ;;  %3877 = vmatpush3.bf16.msra.mxu0 %v3874_v55 }
 0x557   :  { %3879 = vmatprep.subr.bf16.mxu0 %v3878_v60 }
 0x559   :  { %3470 = vmatmul.mubr.msk.f32.gmra.mrb[26].mxu0 %vm2276_vm15, %v2157_v9  ;;  %v2684_v9 = vld [vmem:[%s5709_s9 + $0x118] sm:$0xff] }
 0x55a   :  { %3472 = vmatprep.mubr.msk.f32.mxu0 %vm4183_vm6, %v4181_v7  ;;  %3881 = vmatpush3.bf16.msra.mxu0 %v3878_v60  ;;  %v2682_v60 = vld [vmem:[%s5709_s9 + $0x108] sm:$0xff] }
 0x55b   :  { %3883 = vmatprep.subr.bf16.mxu0 %v3882_v14  ;;  %v3938_v61 = vpack.c.bf16 %v2682_v60, %v2681_v59  ;;  %v2987_v59 = vld [vmem:[%s5712_s12 + $0x30] sm:$0xff]  ;;  %v2988_v60 = vld [vmem:[%s5712_s12 + $0x38] sm:$0xff] }
 0x55d   :  { %3473 = vmatmul.mubr.msk.f32.gmra.mrb[28].mxu0 %vm2276_vm15, %v2158_v0  ;;  %v2685_v0 = vld [vmem:[%s5709_s9 + $0x120] sm:$0xff] }
 0x55e   :  { %3885 = vmatpush3.bf16.msra.mxu0 %v3882_v14  ;;  %v3942_v14 = vpack.c.bf16 %v2684_v9, %v2683_v8  ;;  %v3946_v13 = vpack.c.bf16 %v2686_v12, %v2685_v0  ;;  %v2989_v8 = vld [vmem:[%s5712_s12 + $0x40] sm:$0xff]  ;;  %v2990_v9 = vld [vmem:[%s5712_s12 + $0x48] sm:$0xff]  ;;  %v2991_v0 = vld [vmem:[%s5712_s12 + $0x50] sm:$0xff] }
 0x55f   :  { %3887 = vmatprep.subr.bf16.mxu0 %v3886_v19  ;;  %v2992_v12 = vld [vmem:[%s5712_s12 + $0x58] sm:$0xff] }
 0x562   :  { %3889 = vmatpush3.bf16.msra.mxu0 %v3886_v19  ;;  %v2687_v19 = vld [vmem:[%s5709_s9 + $0x130] sm:$0xff] }
 0x563   :  { %3891 = vmatprep.subr.bf16.mxu0 %v3890_v44  ;;  %v3950_v37 = vpack.c.bf16 %v2688_v28, %v2687_v19  ;;  %v2993_v19 = vld [vmem:[%s5712_s12 + $0x60] sm:$0xff]  ;;  %v2994_v28 = vld [vmem:[%s5712_s12 + $0x68] sm:$0xff] }
 0x566   :  { %3893 = vmatpush3.bf16.msra.mxu0 %v3890_v44  ;;  %v2775_v44 = vld [vmem:[%s5709_s9 + $0x150] sm:$0xff] }
 0x567   :  { %3974 = vmatprep.subr.bf16.mxu0 %v4182_v62 }
 0x628   :  { %v2355_v47 = vpop.f32.mrb[24].mxu0 }
 0x629   :  { %v3468_v50 = vpop.f32.mrb[25].mxu0  ;;  %3518 = vmatprep.mubr.msk.f32.mxu1 %vm2375_vm5, %v2355_v47  ;;  %vm2369_vm8 = vcmp.ne.f32.partialorder %v2355_v47, 0.0  ;;  %v2424_v20 = vrot.slane %v2355_v47, 1  ;;  %v2595_v17 = vrot.slane %v2355_v47, 2  ;;  %v2689_v16 = vrot.slane %v2355_v47, 3 }
 0x62a   :  { %v2372_v1 = vsel %vm2369_vm8, 1, %v4184_v10  ;;  %v2783_v27 = vrot.slane %v2355_v47, 4  ;;  %v2776_v47 = vld [vmem:[%s5709_s9 + $0x158] sm:$0xff]  ;;  %v2778_v50 = vld [vmem:[%s5709_s9 + $0x168] sm:$0xff] }
 0x62b   :  { %v2376_v26 = vsel %vm2375_vm5, %v2372_v1, 0  ;;  %v3958_v38 = vpack.c.bf16 %v2776_v47, %v2775_v44  ;;  %v3962_v2 = vpack.c.bf16 %v2778_v50, %v2777_v5  ;;  %v2780_v1 = vld [vmem:[%s5709_s9 + $0x178] sm:$0xff] }
 0x62c   :  { %v5454_v24 = vpop.f32.mrb[26].mxu0 }
 0x62d   :  { %3519 = vmatmul.mubr.msk.f32.vlgmr.msra.gmra.mrb[34].mxu1 %vm2375_vm5, %v5454_v24  ;;  %v3471_v30 = vpop.f32.mrb[27].mxu0  ;;  %vm2370_vm9 = vcmp.ne.f32.partialorder %v5454_v24, 0.0  ;;  %v2425_v21 = vrot.slane %v5454_v24, 1  ;;  %v2596_v18 = vrot.slane %v5454_v24, 2  ;;  %v2690_v22 = vrot.slane %v5454_v24, 3 }
 0x62e   :  { %3917 = vmatpush3.bf16.msra.mxu1 %v3914_v15  ;;  %v2373_v25 = vsel %vm2370_vm9, 1, %v4184_v10  ;;  %v2784_v29 = vrot.slane %v5454_v24, 4  ;;  %v2773_v15 = vld [vmem:[%s5709_s9 + $0x140] sm:$0xff] }
 0x62f   :  { %v2377_v31 = vsel %vm2375_vm5, %v2373_v25, 0  ;;  %v2426_v32 = vsel %vm147_vm0, %v2424_v20, %v2425_v21  ;;  %3919 = vmatprep.subr.bf16.mxu1 %v3918_v4  ;;  %v2597_v34 = vsel %vm431_vm2, %v2595_v17, %v2596_v18  ;;  %v2691_v33 = vsel %vm602_vm3, %v2689_v16, %v2690_v22  ;;  %v2781_v20 = vld [vmem:[%s5709_s9 + $0x180] sm:$0xff]  ;;  %v2782_v17 = vld [vmem:[%s5709_s9 + $0x188] sm:$0xff] }
 0x630   :  { %v2365_v35 = vpop.f32.mrb[28].mxu0  ;;  %v2380_v6 = vadd.s32 %v2377_v31, %v2376_v26  ;;  %3495 = vmatprep.mubr.msk.f32.mxu0 %vm2375_vm5, %v2426_v32  ;;  %3541 = vmatprep.mubr.msk.f32.mxu1 %vm2375_vm5, %v2597_v34  ;;  %v5482_v42 = vsel %vm773_vm4, %v2783_v27, %v2784_v29  ;;  %v3954_v41 = vpack.c.bf16 %v2774_v63, %v2773_v15  ;;  %v3308_v24 = vld [vmem:[%s5710_s10] ss:$0 sm:$0xff]  ;;  %vm2883_vm2 = vcmask 1041408   ;;  %v2995_v15 = vld [vmem:[%s5712_s12 + $0x70] sm:$0xff]  ;;  %s4121_s10 = spop %4120 }
 0x631   :  { %vm2371_vm0 = vcmp.ne.f32.partialorder %v2365_v35, 0.0  ;;  %3496 = vmatmul.mubr.msk.f32.vlgmr.msra.gmra.mrb[30].mxu0 %vm2375_vm5, %v2425_v21  ;;  %v3474_v45 = vpop.f32.mrb[29].mxu0  ;;  %vm3976_vm3 = vmpackc.low %vm2883_vm2, %vm4185_vm1 }
 0x632   :  { %v2374_v46 = vsel %vm2371_vm0, 1, %v4184_v10  ;;  %3921 = vmatpush3.bf16.msra.mxu1 %v3918_v4  ;;  %3594 = vmatprep.mubr.msk.f32.mxu0 %vm4183_vm6, %v4181_v7  ;;  %v3966_v4 = vpack.c.bf16 %v2780_v1, %v2779_v11  ;;  %v3078_v11 = vld [vmem:[%s5714_s14] sm:$0xff]  ;;  %v3079_v1 = vld [vmem:[%s5714_s14 + $0x8] sm:$0xff] }
 0x633   :  { %v2379_v48 = vsel %vm2378_vm10, %v2374_v46, 0  ;;  %3923 = vmatprep.subr.bf16.mxu1 %v3922_v43 }
 0x634   :  { %v2381_v49 = vadd.s32 %v2380_v6, %v2379_v48 }
 0x636   :  { %3925 = vmatpush3.bf16.msra.mxu1 %v3922_v43  ;;  %v2383_v52 = vshrl.u32 %v2381_v49, 16  ;;  %v2382_v53 = vand.u32 65535, %v2381_v49  ;;  %v3970_v43 = vpack.c.bf16 %v2782_v17, %v2781_v20  ;;  %v2981_v49 = vld [vmem:[%s5712_s12] sm:$0xff]  ;;  %v3081_v20 = vld [vmem:[%s5714_s14 + $0x18] sm:$0xff] }
 0x637   :  { %3927 = vmatprep.subr.bf16.mxu1 %v3926_v36 }
 0x638   :  { %v2385_v55 = vcvt.s32.f32 %v2383_v52  ;;  %v2384_v56 = vcvt.s32.f32 %v2382_v53  ;;  %v2878_v52 = vld [vmem:[%s5711_s11] sm:$0x3]  ;;  %v3979_v53 = vpack.c.bf16 %v2982_v51, %v2981_v49 }
 0x63a   :  { %3929 = vmatpush3.bf16.msra.mxu1 %v3926_v36  ;;  %2388 = vadd.xlane.f32.xlu0 %v2385_v55  ;;  %v2984_v55 = vld [vmem:[%s5712_s12 + $0x18] sm:$0xff] }
 0x63b   :  { %2386 = vadd.xlane.f32.xlu1 %v2384_v56  ;;  %3931 = vmatprep.subr.bf16.mxu1 %v3930_v54 }
 0x63e   :  { %3933 = vmatpush3.bf16.msra.mxu1 %v3930_v54  ;;  %v2983_v54 = vld [vmem:[%s5712_s12 + $0x10] sm:$0xff] }
 0x63f   :  { %3935 = vmatprep.subr.bf16.mxu1 %v3934_v58  ;;  %v3982_v56 = vpack.c.bf16 %v2984_v55, %v2983_v54 }
 0x641   :  { %3542 = vmatmul.mubr.msk.f32.vlgmr.msra.gmra.mrb[34].mxu1 %vm2375_vm5, %v2596_v18 }
 0x642   :  { %3937 = vmatpush3.bf16.msra.mxu1 %v3934_v58  ;;  %3564 = vmatprep.mubr.msk.f32.mxu1 %vm2375_vm5, %v2691_v33  ;;  %v3985_v58 = vpack.c.bf16 %v2986_v57, %v2985_v3 }
 0x643   :  { %3939 = vmatprep.subr.bf16.mxu1 %v3938_v61 }
 0x646   :  { %3941 = vmatpush3.bf16.msra.mxu1 %v3938_v61  ;;  %v3988_v61 = vpack.c.bf16 %v2988_v60, %v2987_v59 }
 0x647   :  { %3943 = vmatprep.subr.bf16.mxu1 %v3942_v14 }
 0x64a   :  { %3945 = vmatpush3.bf16.msra.mxu1 %v3942_v14  ;;  %v3991_v14 = vpack.c.bf16 %v2990_v9, %v2989_v8 }
 0x64b   :  { %3947 = vmatprep.subr.bf16.mxu1 %v3946_v13 }
 0x64e   :  { %3949 = vmatpush3.bf16.msra.mxu1 %v3946_v13  ;;  %v3994_v13 = vpack.c.bf16 %v2992_v12, %v2991_v0 }
 0x64f   :  { %3951 = vmatprep.subr.bf16.mxu1 %v3950_v37 }
 0x652   :  { %3953 = vmatpush3.bf16.msra.mxu1 %v3950_v37  ;;  %v3997_v37 = vpack.c.bf16 %v2994_v28, %v2993_v19 }
 0x653   :  { %3955 = vmatprep.subr.bf16.mxu1 %v3954_v41 }
 0x655   :  { %3565 = vmatmul.mubr.msk.f32.vlgmr.msra.gmra.mrb[34].mxu1 %vm2375_vm5, %v2690_v22 }
 0x656   :  { %3957 = vmatpush3.bf16.msra.mxu1 %v3954_v41  ;;  %3587 = vmatprep.mubr.msk.f32.mxu1 %vm2375_vm5, %v5482_v42 }
 0x657   :  { %3959 = vmatprep.subr.bf16.mxu1 %v3958_v38 }
 0x65a   :  { %3961 = vmatpush3.bf16.msra.mxu1 %v3958_v38 }
 0x65b   :  { %3963 = vmatprep.subr.bf16.mxu1 %v3962_v2 }
 0x65e   :  { %3965 = vmatpush3.bf16.msra.mxu1 %v3962_v2 }
 0x65f   :  { %3967 = vmatprep.subr.bf16.mxu1 %v3966_v4 }
 0x662   :  { %3969 = vmatpush3.bf16.msra.mxu1 %v3966_v4  ;;  %v4000_v4 = vpack.c.bf16 %v3079_v1, %v3078_v11 }
 0x663   :  { %3971 = vmatprep.subr.bf16.mxu1 %v3970_v43 }
 0x666   :  { %3973 = vmatpush3.bf16.msra.mxu1 %v3970_v43  ;;  %v3082_v43 = vld [vmem:[%s5714_s14 + $0x20] sm:$0xff] }
 0x669   :  { %3588 = vmatmul.mubr.msk.f32.vlgmr.msra.gmra.mrb[34].mxu1 %vm2375_vm5, %v2784_v29 }
 0x6c7   :  { %v2389_v16 = vpop.xlane.xlu0 %2388 }
 0x6c8   :  { %v2391_v30 = vcvt.f32.s32 %v2389_v16  ;;  %v2387_v21 = vpop.xlane.xlu1 %2386  ;;  %v3083_v16 = vld [vmem:[%s5714_s14 + $0x28] sm:$0xff] }
 0x6c9   :  { %v2390_v22 = vcvt.f32.s32 %v2387_v21  ;;  %v3084_v21 = vld [vmem:[%s5714_s14 + $0x30] sm:$0xff] }
 0x6ca   :  { %v2392_v18 = vshll.u32 %v2391_v30, 16  ;;  %v4006_v30 = vpack.c.bf16 %v3083_v16, %v3082_v43 }
 0x6cc   :  { %v2393_v25 = vadd.s32 %v2392_v18, %v2390_v22  ;;  %v3085_v18 = vld [vmem:[%s5714_s14 + $0x38] sm:$0xff] }
 0x6cd   :  { %v4009_v22 = vpack.c.bf16 %v3085_v18, %v3084_v21 }
 0x6ce   :  { %v2394_v26 = vrot.slane %v2393_v25, 4 }
 0x6d0   :  { %v2395_v27 = vadd.s32 %v2394_v26, %v2393_v25  ;;  %v3086_v25 = vld [vmem:[%s5714_s14 + $0x40] sm:$0xff]  ;;  %v3087_v26 = vld [vmem:[%s5714_s14 + $0x48] sm:$0xff] }
 0x6d2   :  { %v2396_v31 = vrot.slane %v2395_v27, 2 }
 0x6d4   :  { %v2397_v32 = vadd.s32 %v2396_v31, %v2395_v27  ;;  %v4012_v27 = vpack.c.bf16 %v3087_v26, %v3086_v25  ;;  %v3088_v31 = vld [vmem:[%s5714_s14 + $0x50] sm:$0xf] }
 0x6d6   :  { %v2398_v34 = vrot.slane %v2397_v32, 1 }
 0x6d8   :  { %v2399_v33 = vadd.s32 %v2398_v34, %v2397_v32 }
 0x6da   :  { %4122 = vpush %v2399_v33 }
 0x704   :  { %v3497_v35 = vpop.f32.mrb[30].mxu0 }
 0x705   :  { %v2497_v6 = vpop.f32.mrb[31].mxu0 }
 0x73c   :  { %v3589_v39 = vpop.f32.mrb[34].mxu1 }
 0x73d   :  { %v4014_v29 = vadd.f32 %v3589_v39, %v3497_v35  ;;  %v2856_v40 = vpop.f32.mrb[35].mxu1 }
 0x73e   :  { %v4015_v42 = vadd.f32 %v2856_v40, %v2497_v6 }
 0x73f   :  { %v2875_v45 = vadd.f32 %v4014_v29, %v3308_v24 }
 0x740   :  { %v2874_v46 = vadd.f32 %v4015_v42, %v3308_v24 }
 0x741   :  { %v2877_v48 = vmax.f32 %v2875_v45, 0.0 }
 0x742   :  { %v2876_v36 = vmax.f32 %v2874_v46, 0.0  ;;  %v121_v46 = vstv %s4119_s7 }
 0x744   :  { %v3975_v23 = vpack.c.bf16 %v2877_v48, %v2876_v36  ;;  %v1282_v48 = vstv %s4121_s10 }
 0x746   :  { %3977 = vmatpush3.bf16.msk.msra.mxu0 %vm3976_vm3, %v3975_v23 }
 0x747   :  { %3978 = vmatprep.subr.bf16.mxu0 %v4182_v62 }
 0x749   :  { %3595 = vmatmul.mubr.msk.f32.vlgmr.msra.gmra.mrb[32].mxu0 %vm2879_vm11, %v2878_v52  ;;  %v3174_v52 = vadd.s32 %v1282_v48, %v121_v46 }
 0x74a   :  { %3980 = vmatpush3.bf16.msra.mxu0 %v3979_v53  ;;  %3627 = vmatprep.mubr.msk.f32.mxu0 %vm4183_vm6, %v4181_v7 }
 0x74b   :  { %3981 = vmatprep.subr.bf16.mxu0 %v4182_v62 }
 0x74e   :  { %3983 = vmatpush3.bf16.msra.mxu0 %v3982_v56 }
 0x74f   :  { %3984 = vmatprep.subr.bf16.mxu0 %v4182_v62 }
 0x752   :  { %3986 = vmatpush3.bf16.msra.mxu0 %v3985_v58 }
 0x753   :  { %3987 = vmatprep.subr.bf16.mxu0 %v4182_v62 }
 0x756   :  { %3989 = vmatpush3.bf16.msra.mxu0 %v3988_v61 }
 0x757   :  { %3990 = vmatprep.subr.bf16.mxu0 %v4182_v62 }
 0x75a   :  { %3992 = vmatpush3.bf16.msra.mxu0 %v3991_v14 }
 0x75b   :  { %3993 = vmatprep.subr.bf16.mxu0 %v4182_v62 }
 0x75e   :  { %3995 = vmatpush3.bf16.msra.mxu0 %v3994_v13 }
 0x75f   :  { %3996 = vmatprep.subr.bf16.mxu0 %v4182_v62 }
 0x762   :  { %3998 = vmatpush3.bf16.msra.mxu0 %v3997_v37 }
 0x763   :  { %3625 = vmatprep.subr.mxu0 %v4181_v7 }
 0x766   :  { %3626 = vmatpush3.msra.mxu0 %v2995_v15 }
 0x767   :  { %3999 = vmatprep.subr.bf16.mxu0 %v4182_v62 }
 0x81c   :  { %v2953_v63 = vpop.f32.mrb[32].mxu0 }
 0x81d   :  { %vm2957_vm1 = vcmp.ne.f32.partialorder %v2953_v63, 0.0  ;;  %v3596_v41 = vpop.f32.mrb[33].mxu0  ;;  %3628 = vmatmul.mubr.msk.f32.vlgmr.msra.gmra.mrb[34].mxu0 %vm3003_vm12, %v2953_v63 }
 0x81e   :  { %v2958_v44 = vsel %vm2957_vm1, 1, %v4184_v10  ;;  %3652 = vmatprep.mubr.msk.f32.mxu0 %vm4183_vm6, %v4181_v7  ;;  %v3080_v10 = vld [vmem:[%s5714_s14 + $0x10] sm:$0xff]  ;;  %4001 = vmatpush3.bf16.msra.mxu0 %v4000_v4  ;;  %s4123_s14 = spop %4122 }
 0x81f   :  { %v2960_v47 = vsel %vm2959_vm13, %v2958_v44, 0  ;;  %v4003_v17 = vpack.c.bf16 %v3081_v20, %v3080_v10  ;;  %4002 = vmatprep.subr.bf16.mxu0 %v4182_v62  ;;  %v2401_v23 = vstv %s4123_s14 }
 0x820   :  { %v2962_v38 = vshrl.u32 %v2960_v47, 16  ;;  %v2961_v5 = vand.u32 65535, %v2960_v47  ;;  %v3175_v54 = vadd.s32 %v3174_v52, %v2401_v23 }
 0x822   :  { %v2964_v50 = vcvt.s32.f32 %v2962_v38  ;;  %v2963_v2 = vcvt.s32.f32 %v2961_v5  ;;  %4004 = vmatpush3.bf16.msra.mxu0 %v4003_v17 }
 0x823   :  { %4005 = vmatprep.subr.bf16.mxu0 %v4182_v62 }
 0x824   :  { %2967 = vadd.xlane.f32.xlu0 %v2964_v50  ;;  %2965 = vadd.xlane.f32.xlu1 %v2963_v2 }
 0x826   :  { %4007 = vmatpush3.bf16.msra.mxu0 %v4006_v30 }
 0x827   :  { %4008 = vmatprep.subr.bf16.mxu0 %v4182_v62 }
 0x82a   :  { %4010 = vmatpush3.bf16.msra.mxu0 %v4009_v22 }
 0x82b   :  { %4011 = vmatprep.subr.bf16.mxu0 %v4182_v62 }
 0x82e   :  { %4013 = vmatpush3.bf16.msra.mxu0 %v4012_v27 }
 0x82f   :  { %3650 = vmatprep.subr.mxu0 %v4181_v7  ;;  %v3311_v7 = vld [vmem:[%s5713_s13] ss:$0 sm:$0xff]  ;;  %s4133_s13 = scalar_lea.vmem %s3196_s30, 16 }
 0x830   :  { %p4134_p0 = scmp.ne.s32.totalorder %s3196_s30, %s4133_s13  ;;  %p4139_p2 = scmp.lt.s32.totalorder %s4137_s18, %s4133_s13 }
 0x832   :  { %3651 = vmatpush3.msk.msra.mxu0 %vm773_vm4, %v3088_v31  ;;  %vm3177_vm4 = vcmask 0   ;;  %p4140_p3 = por %p4139_p2, %p4138_p1 }
 0x834   :  { %p4141_p4 = pnand %p4140_p3, %p4134_p0 }
 0x8b1   :  { %v2968_v32 = vpop.xlane.xlu0 %2967  ;;  %v2966_v62 = vpop.xlane.xlu1 %2965 }
 0x8b2   :  { %v2970_v34 = vcvt.f32.s32 %v2968_v32  ;;  %v2969_v35 = vcvt.f32.s32 %v2966_v62 }
 0x8b4   :  { %v2971_v33 = vshll.u32 %v2970_v34, 16 }
 0x8b6   :  { %v2972_v6 = vadd.s32 %v2971_v33, %v2969_v35 }
 0x8b8   :  { %v2973_v39 = vrot.slane %v2972_v6, 4 }
 0x8ba   :  { %v2974_v24 = vadd.s32 %v2973_v39, %v2972_v6 }
 0x8bc   :  { %v2975_v29 = vrot.slane %v2974_v24, 2 }
 0x8be   :  { %v2976_v40 = vadd.s32 %v2975_v29, %v2974_v24 }
 0x8c0   :  { %v2977_v42 = vrot.slane %v2976_v40, 1 }
 0x8c2   :  { %v2978_v45 = vadd.s32 %v2977_v42, %v2976_v40 }
 0x8c4   :  { %4124 = vpush %v2978_v45 }
 0x8f0   :  { %v3073_v36 = vpop.f32.mrb[34].mxu0 }
 0x8f1   :  { %v3074_v49 = vadd.f32 %v3311_v7, %v3073_v36  ;;  %v3629_v51 = vpop.f32.mrb[35].mxu0 }
 0x8f3   :  { %v3077_v53 = vmax.f32 %v3074_v49, 0.0 }
 0x8f5   :  { %s4125_s12 = spop %4124  ;;  %3653 = vmatmul.mubr.msk.f32.vlgmr.msra.gmra.mrb[36].mxu0 %vm1252_vm7, %v3077_v53 }
 0x8f6   :  { %v2980_v55 = vstv %s4125_s12 }
 0x8f7   :  { %v3176_v56 = vadd.s32 %v3175_v54, %v2980_v55 }
 0x8f9   :  { %3178 = vst.msk [vmem:[#allocation4] sm:$0x1] %vm3177_vm4, %v3176_v56 }
 0x8fa   :  { %4144 = shalt.err (!%p4141_p4)
}
 0x8fb   :  { %s4145_s1 = scalar_lea.hbm %s5717_s17, 16 }
 0x8fc   :  { %p4146_p5 = scmp.ne.s32.totalorder %s5717_s17, %s4145_s1  ;;  %p4149_p6 = scmp.lt.u32.totalorder %s4145_s1, %s5717_s17 }
 0x8fe   :  { %p4151_p7 = pnand %p4149_p6, %p4146_p5 }
 0x900   :  { %4154 = shalt.err (!%p4151_p7)
}
 0x901   :  { %3198 = dma.vmem_to_hbm [thread:$0]  %s3196_s30, 16, %s5717_s17, [#allocation5]   ;;  %v3313_v3 = vld [vmem:[%s5715_s15] ss:$0 sm:$0xff]  ;;  %vm3172_vm6 = vcmask 74752  }
 0x902   :  { %s4187_s5 = smov [#allocation2]  }
 0x903   :  { %s3185_s29 = sshll.u32 %s4187_s5, 4  ;;  %s3186_s29 = int_to_ptr.vmem [resolvable:$true] %s3185_s29 }
 0x904   :  { %s4155_s9 = scalar_lea.vmem %s3186_s29, 32  ;;  %p4160_p9 = scmp.lt.s32.totalorder %s3186_s29, %s3186_s29 }
 0x905   :  { %p4156_p8 = scmp.ne.s32.totalorder %s3186_s29, %s4155_s9  ;;  %p4161_p10 = scmp.lt.s32.totalorder %s4155_s9, %s4155_s9 }
 0x907   :  { %p4162_p11 = por %p4161_p10, %p4160_p9 }
 0x909   :  { %p4163_p12 = pnand %p4162_p11, %p4156_p8 }
 0x9c8   :  { %v3168_v57 = vpop.f32.mrb[36].mxu0 }
 0x9c9   :  { %v3169_v58 = vadd.f32 %v3313_v3, %v3168_v57  ;;  %v3654_v59 = vpop.f32.mrb[37].mxu0 }
 0x9cb   :  { %3173 = vst.msk [vmem:[#allocation2] sm:$0x3] %vm3172_vm6, %v3169_v58 }
 0x9cc   :  { %4166 = shalt.err (!%p4163_p12)
}
 0x9cd   :  { %s4167_s3 = scalar_lea.hbm %s5716_s16, 32 }
 0x9ce   :  { %p4168_p13 = scmp.ne.s32.totalorder %s5716_s16, %s4167_s3  ;;  %p4171_p0 = scmp.lt.u32.totalorder %s4167_s3, %s5716_s16 }
 0x9d0   :  { %p4173_p1 = pnand %p4171_p0, %p4168_p13 }
 0x9d2   :  { %4176 = shalt.err (!%p4173_p1)
}
 0x9d3   :  { %3188 = dma.vmem_to_hbm [thread:$0]  %s3186_s29, 32, %s5716_s16, [#allocation3]  }
 0x9d4   :  { %4177 = dma.done.wait [#allocation3], 32  }
 0x9d5   :  { %4178 = vsyncadd [#allocation3], 4294967264 }
 0x9d6   :  { %4179 = dma.done.wait [#allocation5], 16  }
 0x9d7   :  { %4180 = vsyncadd [#allocation5], 4294967280 }
 0x9d8   :  { %3205 = vsyncpa [#allocation3], 1 }
 0x9d9   :  { %3206 = vsyncpa [#allocation5], 1 }

</bundles_post_ra>
